<compile_context>
chip_gen: v7x
topology: tpu7x:2x2x1
jax: 0.10.0
libtpu: 0.0.40
codegen_flags: <defaults>
</compile_context>

<pallas_src>
import functools

import numpy as np
import jax
import jax.numpy as jnp
from jax.experimental import pallas as pl
from jax.experimental.pallas import tpu as pltpu

# ---- HashGrid hyper-parameters (from the PyTorch module __init__) ----
INPUT_DIM = 3
N_LEVELS = 4
N_FEATURES_PER_LEVEL = 2
LOG2_HASHMAP_SIZE = 15
BASE_RESOLUTION = 12.0
PER_LEVEL_SCALE = 1.5

HASHMAP_SIZE = 1 << LOG2_HASHMAP_SIZE
N_CORNERS = 1 << INPUT_DIM
LC = N_LEVELS * N_CORNERS                 # (level, corner) rows = 32
LF = N_LEVELS * N_FEATURES_PER_LEVEL      # output features = 8

# tcnn coherent prime hash constants
_PRIMES = (1, 2654435761, 805459861, 3674653429, 2097192037, 1434869437, 2165219737)

# corner -> per-dimension bit (tcnn convention: bit d of the corner id selects +1 along dim d)
_CORNER_BITS = np.array(
    [[(c >> d) & 1 for d in range(INPUT_DIM)] for c in range(N_CORNERS)], dtype=np.int32
)  # (2^D, D)


def _i32(v):
    """Wrap an unsigned 32-bit constant into int32 two's complement (uint32 wrap semantics)."""
    v = int(v) & 0xFFFFFFFF
    if v >= 1 << 31:
        v -= 1 << 32
    return jnp.int32(v)


def _round_up(v, m):
    return ((v + m - 1) // m) * m


def make_level_meta():
    """Static per-level metadata mirroring tcnn's GridEncoding setup (host-side python values)."""
    meta = []
    offset = 0
    for lvl in range(N_LEVELS):
        scale = float(np.exp2(lvl * np.log2(PER_LEVEL_SCALE)) * BASE_RESOLUTION - 1.0)
        res = int(np.ceil(scale)) + 1
        dense_size = res ** INPUT_DIM
        size = min(((dense_size + 7) // 8) * 8, HASHMAP_SIZE)  # next_multiple(., 8), capped
        dense = size >= dense_size                             # tcnn: hash only if level size < res**D
        if dense:
            # The kernels reduce the dense linear index with a single conditional
            # subtraction; assert the idx < 2*size assumption so future resolution
            # changes cannot silently break it.
            max_coord = int(np.floor(scale + 0.5)) + 1
            max_flat = sum(max_coord * (res ** d) for d in range(INPUT_DIM))
            assert max_flat < 2 * size, "dense-level conditional-subtract modulo assumption violated"
        meta.append(dict(scale=scale, res=res, dense=dense, size=size, offset=offset))
        offset += size
    return meta, offset  # offset == total number of grid entries across levels


# ---------------- Pallas kernel 1: per-(level, corner) hash-table indices ----------------
def _index_kernel(bits_ref, xt_ref, idx_ref, *, meta):
    """bits_ref: (2^D, D) int32 corner bits.  xt_ref: (D, TN) f32 in [0,1], points on lanes.
    idx_ref: (LC, TN) int32."""
    bits = bits_ref[...]                                       # (2^D, D) int32
    x = xt_ref[...]                                            # (D, TN)
    for lvl, m in enumerate(meta):                             # static unroll over levels
        pos = x * m["scale"] + 0.5
        gridi = jnp.floor(pos).astype(jnp.int32)               # (D, TN)
        idx = None
        stride = 1
        for d in range(INPUT_DIM):                             # static unroll over dims
            bit = bits[:, d:d + 1]                             # (2^D, 1) int32
            coord = gridi[d:d + 1, :] + bit                    # (2^D, TN): all corners at once
            if m["dense"]:
                term = coord if stride == 1 else coord * stride
                stride *= m["res"]
            else:
                p = _PRIMES[d]
                # int32 wrap-around multiply == uint32 wrap (two's complement, XLA-defined)
                term = coord if p == 1 else coord * _i32(p)
            if idx is None:
                idx = term
            elif m["dense"]:
                idx = idx + term
            else:
                idx = jnp.bitwise_xor(idx, term)
        if m["dense"]:
            size = m["size"]
            idx = jnp.where(idx >= size, idx - size, idx)      # == idx % size (idx < 2*size)
        else:
            idx = jnp.bitwise_and(idx, jnp.int32(m["size"] - 1))
        # Per-level store (sublane-aligned 8-row slab) instead of a trailing concat.
        idx_ref[lvl * N_CORNERS:(lvl + 1) * N_CORNERS, :] = idx + jnp.int32(m["offset"])


# ---------------- Pallas kernel 2: trilinear interpolation of gathered corners ----------------
def _interp_kernel(bits_ref, xt_ref, f_ref, o_ref, *, meta):
    """bits_ref: (2^D, D) int32.  xt_ref: (D, TN) f32.
    f_ref: (2*LC, TN) bf16 (rows [0,LC)=feature 0, [LC,2LC)=feature 1).
    o_ref: (LF, TN) f32, row 2*level + feature."""
    bits = bits_ref[...]                                       # (2^D, D) int32
    x = xt_ref[...]                                            # (D, TN)
    for lvl, m in enumerate(meta):                             # static unroll over levels
        pos = x * m["scale"] + 0.5
        frac = pos - jnp.floor(pos)                            # (D, TN)
        one_m = 1.0 - frac                                     # hoisted per-dim factors
        # All 2^D corner weights at once via broadcast against the (2^D, 1) bit columns.
        w = None
        for d in range(INPUT_DIM):
            bit = bits[:, d:d + 1]                             # (2^D, 1)
            wd = jnp.where(bit == 1, frac[d:d + 1, :], one_m[d:d + 1, :])  # (2^D, TN)
            w = wd if w is None else w * wd
        base = lvl * N_CORNERS
        f0 = f_ref[base:base + N_CORNERS, :].astype(jnp.float32)           # (2^D, TN)
        f1 = f_ref[LC + base:LC + base + N_CORNERS, :].astype(jnp.float32)
        # Corner reduction as an 8-sublane sum (XLU slot), stored per level.
        o_ref[2 * lvl:2 * lvl + 1, :] = jnp.sum(w * f0, axis=0, keepdims=True)
        o_ref[2 * lvl + 1:2 * lvl + 2, :] = jnp.sum(w * f1, axis=0, keepdims=True)


def hashgrid_forward(x, params, meta, *, tile_n=8192):
    """x: (N, INPUT_DIM) f32 in [0, 1].  params: flat (total_entries * F,) f32.
    Returns (N, N_LEVELS * N_FEATURES_PER_LEVEL) f32, level-major then feature."""
    N, D = x.shape
    assert D == INPUT_DIM
    # Keep >= 2 grid steps for small N (v7x has 2 TensorCores); always a multiple of 128.
    tile_n = max(128, min(tile_n, _round_up(pl.cdiv(N, 2), 128)))
    n_tiles = pl.cdiv(N, tile_n)
    Np = n_tiles * tile_n

    xt = jnp.transpose(x)                                      # (D, N): points -> lane axis
    if Np != N:
        xt = jnp.pad(xt, ((0, 0), (0, Np - N)))                # padded coords (=0) are valid

    corner_bits = jnp.asarray(_CORNER_BITS)                    # (2^D, D) int32, passed as input

    idx = pl.pallas_call(
        functools.partial(_index_kernel, meta=meta),
        out_shape=jax.ShapeDtypeStruct((LC, Np), jnp.int32),
        grid=(n_tiles,),
        in_specs=[pl.BlockSpec((N_CORNERS, INPUT_DIM), lambda i: (0, 0)),
                  pl.BlockSpec((D, tile_n), lambda i: (0, i))],
        out_specs=pl.BlockSpec((LC, tile_n), lambda i: (0, i)),
        compiler_params=pltpu.CompilerParams(dimension_semantics=("parallel",)),
    )(corner_bits, xt)

    # TODO(synk): the hash-table row gather stays in XLA — Pallas TPU has no general
    # large-table vectorized gather, so the table cannot be gathered in-VMEM inside the
    # kernel; everything around it is fused / lane-dense instead.
    # bf16 table (tcnn uses fp16 params) halves gather payload + feats HBM round trip.
    table = params.reshape(-1, N_FEATURES_PER_LEVEL).astype(jnp.bfloat16)  # (total, F)
    # Two feature-column gathers land directly in the (2*LC, Np) lane-dense layout.
    f0 = table[:, 0].at[idx].get(mode="promise_in_bounds")     # (LC, Np) bf16
    f1 = table[:, 1].at[idx].get(mode="promise_in_bounds")     # (LC, Np) bf16
    feats = jnp.concatenate([f0, f1], axis=0)                  # (2*LC, Np) bf16

    out_t = pl.pallas_call(
        functools.partial(_interp_kernel, meta=meta),
        out_shape=jax.ShapeDtypeStruct((LF, Np), jnp.float32),
        grid=(n_tiles,),
        in_specs=[pl.BlockSpec((N_CORNERS, INPUT_DIM), lambda i: (0, 0)),
                  pl.BlockSpec((D, tile_n), lambda i: (0, i)),
                  pl.BlockSpec((N_FEATURES_PER_LEVEL * LC, tile_n), lambda i: (0, i))],
        out_specs=pl.BlockSpec((LF, tile_n), lambda i: (0, i)),
        compiler_params=pltpu.CompilerParams(dimension_semantics=("parallel",)),
    )(corner_bits, xt, feats)

    # TODO(synk): keep (LF, N) feature-major for Pallas consumers; transpose only to
    # match the module's (N, LF) contract.
    return jnp.transpose(out_t[:, :N])                         # (N, LF)


# ---------------- Pure-JAX reference (same math, XLA lowering) ----------------
def _corner_index_weight(gridi, frac, corner, m):
    """Flat table index + interpolation weight of one grid corner (point-major reference)."""
    w = None
    idx = None
    stride = 1
    for d in range(INPUT_DIM):
        bit = (corner >> d) & 1
        coord = gridi[:, d:d + 1] + bit                 # (N, 1) int32
        fd = frac[:, d:d + 1]
        wd = fd if bit else (1.0 - fd)
        w = wd if w is None else w * wd
        if m["dense"]:
            term = coord * stride
            stride *= m["res"]
        else:
            term = coord * _i32(_PRIMES[d])
        if idx is None:
            idx = term
        else:
            idx = idx + term if m["dense"] else jnp.bitwise_xor(idx, term)
    if m["dense"]:
        size = m["size"]
        idx = jnp.where(idx >= size, idx - size, idx)
    else:
        idx = jnp.bitwise_and(idx, jnp.int32(HASHMAP_SIZE - 1))
    return idx + jnp.int32(m["offset"]), w


def hashgrid_reference(x, params, meta):
    # Same bf16 table quantization as the kernel path, upcast to f32 for the math.
    table = params.reshape(-1, N_FEATURES_PER_LEVEL).astype(jnp.bfloat16).astype(jnp.float32)
    outs = []
    for m in meta:
        pos = x * m["scale"] + 0.5
        gridf = jnp.floor(pos)
        frac = pos - gridf
        gridi = gridf.astype(jnp.int32)
        acc = jnp.zeros((x.shape[0], N_FEATURES_PER_LEVEL), jnp.float32)
        for c in range(N_CORNERS):
            idx, w = _corner_index_weight(gridi, frac, c, m)
            acc = acc + w * table[idx[:, 0]]
        outs.append(acc)
    return jnp.concatenate(outs, axis=1)


if __name__ == "__main__":
    key = jax.random.PRNGKey(0)
    kx, kp = jax.random.split(key)

    meta, total_entries = make_level_meta()

    N = 1000                                   # not a multiple of the tile: exercises padding + 2 tiles
    x = jax.random.uniform(kx, (N, INPUT_DIM), dtype=jnp.float32)
    # tcnn initializes hash-grid params ~ U(-1e-4, 1e-4); deterministic synthetic init here.
    params = jax.random.uniform(kp, (total_entries * N_FEATURES_PER_LEVEL,),
                                dtype=jnp.float32, minval=-1e-4, maxval=1e-4)

    fwd = jax.jit(lambda a, b: hashgrid_forward(a, b, meta))
    out = jax.block_until_ready(fwd(x, params))
    assert out.shape == (N, N_LEVELS * N_FEATURES_PER_LEVEL)

    ref = hashgrid_reference(x, params, meta)
    np.testing.assert_allclose(np.asarray(out), np.asarray(ref), atol=1e-7, rtol=1e-5)

    print("KERNEL_OK")
</pallas_src>

<mosaic_0001>
module attributes {stable_mosaic.version = 11 : i64} {
  func.func private @main(%arg0: i32) attributes {dimension_semantics = [#tpu.dimension_semantics<core_parallel>], iteration_bounds = array<i64: 2>, tpu.core_type = #tpu.core_type<sc_scalar_subcore>, window_params = []} {
    return
  }
}

module attributes {stable_mosaic.version = 11 : i64} {
  func.func private @main(%arg0: i32) attributes {dimension_semantics = [#tpu.dimension_semantics<core_parallel>], iteration_bounds = array<i64: 2>, tpu.core_type = #tpu.core_type<sc_scalar_subcore>, window_params = []} {
    return
  }
}

module attributes {stable_mosaic.version = 11 : i64} {
  func.func @_index_kernel(%arg0: i32, %arg1: memref<8x3xi32, #tpu.memory_space<vmem>>, %arg2: memref<3x512xf32, #tpu.memory_space<vmem>>, %arg3: memref<32x512xi32, #tpu.memory_space<vmem>>) attributes {dimension_semantics = [#tpu.dimension_semantics<parallel>], iteration_bounds = array<i64: 2>, scalar_prefetch = 0 : i64, scratch_operands = 0 : i64, tpu.core_type = #tpu.core_type<tc>, window_params = [{pipeline_mode = #tpu.pipeline_mode<synchronous>, transform_indices = @transform_0, window_bounds = array<i64: 8, 3>}, {transform_indices = @transform_1, window_bounds = array<i64: 3, 512>}, {transform_indices = @transform_2, window_bounds = array<i64: 32, 512>}]} {
    %c0 = arith.constant 0 : index
    %c0_0 = arith.constant 0 : index
    %0 = vector.load %arg1[%c0, %c0_0] : memref<8x3xi32, #tpu.memory_space<vmem>>, vector<8x3xi32>
    %c0_1 = arith.constant 0 : index
    %c0_2 = arith.constant 0 : index
    %1 = vector.load %arg2[%c0_1, %c0_2] : memref<3x512xf32, #tpu.memory_space<vmem>>, vector<3x512xf32>
    %cst = arith.constant 1.100000e+01 : f32
    %2 = vector.broadcast %cst : f32 to vector<3x512xf32>
    %3 = arith.mulf %1, %2 : vector<3x512xf32>
    %cst_3 = arith.constant 5.000000e-01 : f32
    %4 = vector.broadcast %cst_3 : f32 to vector<3x512xf32>
    %5 = arith.addf %3, %4 : vector<3x512xf32>
    %6 = math.floor %5 : vector<3x512xf32>
    %7 = arith.fptosi %6 : vector<3x512xf32> to vector<3x512xi32>
    %8 = vector.extract_strided_slice %0 {offsets = [0, 0], sizes = [8, 1], strides = [1, 1]} : vector<8x3xi32> to vector<8x1xi32>
    %9 = vector.extract_strided_slice %7 {offsets = [0, 0], sizes = [1, 512], strides = [1, 1]} : vector<3x512xi32> to vector<1x512xi32>
    %10 = vector.broadcast %9 : vector<1x512xi32> to vector<8x512xi32>
    %11 = vector.broadcast %8 : vector<8x1xi32> to vector<8x512xi32>
    %12 = arith.addi %10, %11 : vector<8x512xi32>
    %13 = vector.extract_strided_slice %0 {offsets = [0, 1], sizes = [8, 1], strides = [1, 1]} : vector<8x3xi32> to vector<8x1xi32>
    %14 = vector.extract_strided_slice %7 {offsets = [1, 0], sizes = [1, 512], strides = [1, 1]} : vector<3x512xi32> to vector<1x512xi32>
    %15 = vector.broadcast %14 : vector<1x512xi32> to vector<8x512xi32>
    %16 = vector.broadcast %13 : vector<8x1xi32> to vector<8x512xi32>
    %17 = arith.addi %15, %16 : vector<8x512xi32>
    %c12_i32 = arith.constant 12 : i32
    %18 = vector.broadcast %c12_i32 : i32 to vector<8x512xi32>
    %19 = arith.muli %17, %18 : vector<8x512xi32>
    %20 = arith.addi %12, %19 : vector<8x512xi32>
    %21 = vector.extract_strided_slice %0 {offsets = [0, 2], sizes = [8, 1], strides = [1, 1]} : vector<8x3xi32> to vector<8x1xi32>
    %22 = vector.extract_strided_slice %7 {offsets = [2, 0], sizes = [1, 512], strides = [1, 1]} : vector<3x512xi32> to vector<1x512xi32>
    %23 = vector.broadcast %22 : vector<1x512xi32> to vector<8x512xi32>
    %24 = vector.broadcast %21 : vector<8x1xi32> to vector<8x512xi32>
    %25 = arith.addi %23, %24 : vector<8x512xi32>
    %c144_i32 = arith.constant 144 : i32
    %26 = vector.broadcast %c144_i32 : i32 to vector<8x512xi32>
    %27 = arith.muli %25, %26 : vector<8x512xi32>
    %28 = arith.addi %20, %27 : vector<8x512xi32>
    %c1728_i32 = arith.constant 1728 : i32
    %29 = vector.broadcast %c1728_i32 : i32 to vector<8x512xi32>
    %30 = arith.cmpi sge, %28, %29 : vector<8x512xi32>
    %c1728_i32_4 = arith.constant 1728 : i32
    %31 = vector.broadcast %c1728_i32_4 : i32 to vector<8x512xi32>
    %32 = arith.subi %28, %31 : vector<8x512xi32>
    %33 = arith.select %30, %32, %28 : vector<8x512xi1>, vector<8x512xi32>
    %c0_i32 = arith.constant 0 : i32
    %34 = vector.broadcast %c0_i32 : i32 to vector<8x512xi32>
    %35 = arith.addi %33, %34 : vector<8x512xi32>
    %c0_5 = arith.constant 0 : index
    %c0_6 = arith.constant 0 : index
    %36 = vector.load %arg3[%c0_5, %c0_6] : memref<32x512xi32, #tpu.memory_space<vmem>>, vector<8x512xi32>
    tpu.vector_store %arg3[%c0_5, %c0_6], %35 {strides = array<i32>} : memref<32x512xi32, #tpu.memory_space<vmem>>, vector<8x512xi32>,
    %cst_7 = arith.constant 1.700000e+01 : f32
    %37 = vector.broadcast %cst_7 : f32 to vector<3x512xf32>
    %38 = arith.mulf %1, %37 : vector<3x512xf32>
    %cst_8 = arith.constant 5.000000e-01 : f32
    %39 = vector.broadcast %cst_8 : f32 to vector<3x512xf32>
    %40 = arith.addf %38, %39 : vector<3x512xf32>
    %41 = math.floor %40 : vector<3x512xf32>
    %42 = arith.fptosi %41 : vector<3x512xf32> to vector<3x512xi32>
    %43 = vector.extract_strided_slice %0 {offsets = [0, 0], sizes = [8, 1], strides = [1, 1]} : vector<8x3xi32> to vector<8x1xi32>
    %44 = vector.extract_strided_slice %42 {offsets = [0, 0], sizes = [1, 512], strides = [1, 1]} : vector<3x512xi32> to vector<1x512xi32>
    %45 = vector.broadcast %44 : vector<1x512xi32> to vector<8x512xi32>
    %46 = vector.broadcast %43 : vector<8x1xi32> to vector<8x512xi32>
    %47 = arith.addi %45, %46 : vector<8x512xi32>
    %48 = vector.extract_strided_slice %0 {offsets = [0, 1], sizes = [8, 1], strides = [1, 1]} : vector<8x3xi32> to vector<8x1xi32>
    %49 = vector.extract_strided_slice %42 {offsets = [1, 0], sizes = [1, 512], strides = [1, 1]} : vector<3x512xi32> to vector<1x512xi32>
    %50 = vector.broadcast %49 : vector<1x512xi32> to vector<8x512xi32>
    %51 = vector.broadcast %48 : vector<8x1xi32> to vector<8x512xi32>
    %52 = arith.addi %50, %51 : vector<8x512xi32>
    %c18_i32 = arith.constant 18 : i32
    %53 = vector.broadcast %c18_i32 : i32 to vector<8x512xi32>
    %54 = arith.muli %52, %53 : vector<8x512xi32>
    %55 = arith.addi %47, %54 : vector<8x512xi32>
    %56 = vector.extract_strided_slice %0 {offsets = [0, 2], sizes = [8, 1], strides = [1, 1]} : vector<8x3xi32> to vector<8x1xi32>
    %57 = vector.extract_strided_slice %42 {offsets = [2, 0], sizes = [1, 512], strides = [1, 1]} : vector<3x512xi32> to vector<1x512xi32>
    %58 = vector.broadcast %57 : vector<1x512xi32> to vector<8x512xi32>
    %59 = vector.broadcast %56 : vector<8x1xi32> to vector<8x512xi32>
    %60 = arith.addi %58, %59 : vector<8x512xi32>
    %c324_i32 = arith.constant 324 : i32
    %61 = vector.broadcast %c324_i32 : i32 to vector<8x512xi32>
    %62 = arith.muli %60, %61 : vector<8x512xi32>
    %63 = arith.addi %55, %62 : vector<8x512xi32>
    %c5832_i32 = arith.constant 5832 : i32
    %64 = vector.broadcast %c5832_i32 : i32 to vector<8x512xi32>
    %65 = arith.cmpi sge, %63, %64 : vector<8x512xi32>
    %c5832_i32_9 = arith.constant 5832 : i32
    %66 = vector.broadcast %c5832_i32_9 : i32 to vector<8x512xi32>
    %67 = arith.subi %63, %66 : vector<8x512xi32>
    %68 = arith.select %65, %67, %63 : vector<8x512xi1>, vector<8x512xi32>
    %c1728_i32_10 = arith.constant 1728 : i32
    %69 = vector.broadcast %c1728_i32_10 : i32 to vector<8x512xi32>
    %70 = arith.addi %68, %69 : vector<8x512xi32>
    %c8 = arith.constant 8 : index
    %c0_11 = arith.constant 0 : index
    %71 = vector.load %arg3[%c8, %c0_11] : memref<32x512xi32, #tpu.memory_space<vmem>>, vector<8x512xi32>
    tpu.vector_store %arg3[%c8, %c0_11], %70 {strides = array<i32>} : memref<32x512xi32, #tpu.memory_space<vmem>>, vector<8x512xi32>,
    %cst_12 = arith.constant 2.600000e+01 : f32
    %72 = vector.broadcast %cst_12 : f32 to vector<3x512xf32>
    %73 = arith.mulf %1, %72 : vector<3x512xf32>
    %cst_13 = arith.constant 5.000000e-01 : f32
    %74 = vector.broadcast %cst_13 : f32 to vector<3x512xf32>
    %75 = arith.addf %73, %74 : vector<3x512xf32>
    %76 = math.floor %75 : vector<3x512xf32>
    %77 = arith.fptosi %76 : vector<3x512xf32> to vector<3x512xi32>
    %78 = vector.extract_strided_slice %0 {offsets = [0, 0], sizes = [8, 1], strides = [1, 1]} : vector<8x3xi32> to vector<8x1xi32>
    %79 = vector.extract_strided_slice %77 {offsets = [0, 0], sizes = [1, 512], strides = [1, 1]} : vector<3x512xi32> to vector<1x512xi32>
    %80 = vector.broadcast %79 : vector<1x512xi32> to vector<8x512xi32>
    %81 = vector.broadcast %78 : vector<8x1xi32> to vector<8x512xi32>
    %82 = arith.addi %80, %81 : vector<8x512xi32>
    %83 = vector.extract_strided_slice %0 {offsets = [0, 1], sizes = [8, 1], strides = [1, 1]} : vector<8x3xi32> to vector<8x1xi32>
    %84 = vector.extract_strided_slice %77 {offsets = [1, 0], sizes = [1, 512], strides = [1, 1]} : vector<3x512xi32> to vector<1x512xi32>
    %85 = vector.broadcast %84 : vector<1x512xi32> to vector<8x512xi32>
    %86 = vector.broadcast %83 : vector<8x1xi32> to vector<8x512xi32>
    %87 = arith.addi %85, %86 : vector<8x512xi32>
    %c27_i32 = arith.constant 27 : i32
    %88 = vector.broadcast %c27_i32 : i32 to vector<8x512xi32>
    %89 = arith.muli %87, %88 : vector<8x512xi32>
    %90 = arith.addi %82, %89 : vector<8x512xi32>
    %91 = vector.extract_strided_slice %0 {offsets = [0, 2], sizes = [8, 1], strides = [1, 1]} : vector<8x3xi32> to vector<8x1xi32>
    %92 = vector.extract_strided_slice %77 {offsets = [2, 0], sizes = [1, 512], strides = [1, 1]} : vector<3x512xi32> to vector<1x512xi32>
    %93 = vector.broadcast %92 : vector<1x512xi32> to vector<8x512xi32>
    %94 = vector.broadcast %91 : vector<8x1xi32> to vector<8x512xi32>
    %95 = arith.addi %93, %94 : vector<8x512xi32>
    %c729_i32 = arith.constant 729 : i32
    %96 = vector.broadcast %c729_i32 : i32 to vector<8x512xi32>
    %97 = arith.muli %95, %96 : vector<8x512xi32>
    %98 = arith.addi %90, %97 : vector<8x512xi32>
    %c19688_i32 = arith.constant 19688 : i32
    %99 = vector.broadcast %c19688_i32 : i32 to vector<8x512xi32>
    %100 = arith.cmpi sge, %98, %99 : vector<8x512xi32>
    %c19688_i32_14 = arith.constant 19688 : i32
    %101 = vector.broadcast %c19688_i32_14 : i32 to vector<8x512xi32>
    %102 = arith.subi %98, %101 : vector<8x512xi32>
    %103 = arith.select %100, %102, %98 : vector<8x512xi1>, vector<8x512xi32>
    %c7560_i32 = arith.constant 7560 : i32
    %104 = vector.broadcast %c7560_i32 : i32 to vector<8x512xi32>
    %105 = arith.addi %103, %104 : vector<8x512xi32>
    %c16 = arith.constant 16 : index
    %c0_15 = arith.constant 0 : index
    %106 = vector.load %arg3[%c16, %c0_15] : memref<32x512xi32, #tpu.memory_space<vmem>>, vector<8x512xi32>
    tpu.vector_store %arg3[%c16, %c0_15], %105 {strides = array<i32>} : memref<32x512xi32, #tpu.memory_space<vmem>>, vector<8x512xi32>,
    %cst_16 = arith.constant 3.950000e+01 : f32
    %107 = vector.broadcast %cst_16 : f32 to vector<3x512xf32>
    %108 = arith.mulf %1, %107 : vector<3x512xf32>
    %cst_17 = arith.constant 5.000000e-01 : f32
    %109 = vector.broadcast %cst_17 : f32 to vector<3x512xf32>
    %110 = arith.addf %108, %109 : vector<3x512xf32>
    %111 = math.floor %110 : vector<3x512xf32>
    %112 = arith.fptosi %111 : vector<3x512xf32> to vector<3x512xi32>
    %113 = vector.extract_strided_slice %0 {offsets = [0, 0], sizes = [8, 1], strides = [1, 1]} : vector<8x3xi32> to vector<8x1xi32>
    %114 = vector.extract_strided_slice %112 {offsets = [0, 0], sizes = [1, 512], strides = [1, 1]} : vector<3x512xi32> to vector<1x512xi32>
    %115 = vector.broadcast %114 : vector<1x512xi32> to vector<8x512xi32>
    %116 = vector.broadcast %113 : vector<8x1xi32> to vector<8x512xi32>
    %117 = arith.addi %115, %116 : vector<8x512xi32>
    %118 = vector.extract_strided_slice %0 {offsets = [0, 1], sizes = [8, 1], strides = [1, 1]} : vector<8x3xi32> to vector<8x1xi32>
    %119 = vector.extract_strided_slice %112 {offsets = [1, 0], sizes = [1, 512], strides = [1, 1]} : vector<3x512xi32> to vector<1x512xi32>
    %120 = vector.broadcast %119 : vector<1x512xi32> to vector<8x512xi32>
    %121 = vector.broadcast %118 : vector<8x1xi32> to vector<8x512xi32>
    %122 = arith.addi %120, %121 : vector<8x512xi32>
    %c-1640531535_i32 = arith.constant -1640531535 : i32
    %123 = vector.broadcast %c-1640531535_i32 : i32 to vector<8x512xi32>
    %124 = arith.muli %122, %123 : vector<8x512xi32>
    %125 = arith.xori %117, %124 : vector<8x512xi32>
    %126 = vector.extract_strided_slice %0 {offsets = [0, 2], sizes = [8, 1], strides = [1, 1]} : vector<8x3xi32> to vector<8x1xi32>
    %127 = vector.extract_strided_slice %112 {offsets = [2, 0], sizes = [1, 512], strides = [1, 1]} : vector<3x512xi32> to vector<1x512xi32>
    %128 = vector.broadcast %127 : vector<1x512xi32> to vector<8x512xi32>
    %129 = vector.broadcast %126 : vector<8x1xi32> to vector<8x512xi32>
    %130 = arith.addi %128, %129 : vector<8x512xi32>
    %c805459861_i32 = arith.constant 805459861 : i32
    %131 = vector.broadcast %c805459861_i32 : i32 to vector<8x512xi32>
    %132 = arith.muli %130, %131 : vector<8x512xi32>
    %133 = arith.xori %125, %132 : vector<8x512xi32>
    %c32767_i32 = arith.constant 32767 : i32
    %134 = vector.broadcast %c32767_i32 : i32 to vector<8x512xi32>
    %135 = arith.andi %133, %134 : vector<8x512xi32>
    %c27248_i32 = arith.constant 27248 : i32
    %136 = vector.broadcast %c27248_i32 : i32 to vector<8x512xi32>
    %137 = arith.addi %135, %136 : vector<8x512xi32>
    %c24 = arith.constant 24 : index
    %c0_18 = arith.constant 0 : index
    %138 = vector.load %arg3[%c24, %c0_18] : memref<32x512xi32, #tpu.memory_space<vmem>>, vector<8x512xi32>
    tpu.vector_store %arg3[%c24, %c0_18], %137 {strides = array<i32>} : memref<32x512xi32, #tpu.memory_space<vmem>>, vector<8x512xi32>,
    return
  }
  func.func @transform_0(%arg0: i32) -> (i32, i32) {
    %c0_i32 = arith.constant 0 : i32
    %c0_i32_0 = arith.constant 0 : i32
    %c0_i32_1 = arith.constant 0 : i32
    return %c0_i32, %c0_i32_0 : i32, i32
  }
  func.func @transform_1(%arg0: i32) -> (i32, i32) {
    %c0_i32 = arith.constant 0 : i32
    %c0_i32_0 = arith.constant 0 : i32
    return %c0_i32, %arg0 : i32, i32
  }
  func.func @transform_2(%arg0: i32) -> (i32, i32) {
    %c0_i32 = arith.constant 0 : i32
    %c0_i32_0 = arith.constant 0 : i32
    return %c0_i32, %arg0 : i32, i32
  }
}

module attributes {stable_mosaic.version = 11 : i64} {
  func.func @_interp_kernel(%arg0: i32, %arg1: memref<8x3xi32, #tpu.memory_space<vmem>>, %arg2: memref<3x512xf32, #tpu.memory_space<vmem>>, %arg3: memref<64x512xbf16, #tpu.memory_space<vmem>>, %arg4: memref<8x512xf32, #tpu.memory_space<vmem>>) attributes {dimension_semantics = [#tpu.dimension_semantics<parallel>], iteration_bounds = array<i64: 2>, scalar_prefetch = 0 : i64, scratch_operands = 0 : i64, tpu.core_type = #tpu.core_type<tc>, window_params = [{pipeline_mode = #tpu.pipeline_mode<synchronous>, transform_indices = @transform_0, window_bounds = array<i64: 8, 3>}, {transform_indices = @transform_1, window_bounds = array<i64: 3, 512>}, {transform_indices = @transform_2, window_bounds = array<i64: 64, 512>}, {transform_indices = @transform_3, window_bounds = array<i64: 8, 512>}]} {
    %c0 = arith.constant 0 : index
    %c0_0 = arith.constant 0 : index
    %0 = vector.load %arg1[%c0, %c0_0] : memref<8x3xi32, #tpu.memory_space<vmem>>, vector<8x3xi32>
    %c0_1 = arith.constant 0 : index
    %c0_2 = arith.constant 0 : index
    %1 = vector.load %arg2[%c0_1, %c0_2] : memref<3x512xf32, #tpu.memory_space<vmem>>, vector<3x512xf32>
    %cst = arith.constant 1.100000e+01 : f32
    %2 = vector.broadcast %cst : f32 to vector<3x512xf32>
    %3 = arith.mulf %1, %2 : vector<3x512xf32>
    %cst_3 = arith.constant 5.000000e-01 : f32
    %4 = vector.broadcast %cst_3 : f32 to vector<3x512xf32>
    %5 = arith.addf %3, %4 : vector<3x512xf32>
    %6 = math.floor %5 : vector<3x512xf32>
    %7 = arith.subf %5, %6 : vector<3x512xf32>
    %cst_4 = arith.constant 1.000000e+00 : f32
    %8 = vector.broadcast %cst_4 : f32 to vector<3x512xf32>
    %9 = arith.subf %8, %7 : vector<3x512xf32>
    %10 = vector.extract_strided_slice %0 {offsets = [0, 0], sizes = [8, 1], strides = [1, 1]} : vector<8x3xi32> to vector<8x1xi32>
    %c1_i32 = arith.constant 1 : i32
    %11 = vector.broadcast %c1_i32 : i32 to vector<8x1xi32>
    %12 = arith.cmpi eq, %10, %11 : vector<8x1xi32>
    %13 = vector.extract_strided_slice %7 {offsets = [0, 0], sizes = [1, 512], strides = [1, 1]} : vector<3x512xf32> to vector<1x512xf32>
    %14 = vector.extract_strided_slice %9 {offsets = [0, 0], sizes = [1, 512], strides = [1, 1]} : vector<3x512xf32> to vector<1x512xf32>
    %15 = vector.shape_cast %12 : vector<8x1xi1> to vector<8x1xi1>
    %16 = vector.broadcast %15 : vector<8x1xi1> to vector<8x512xi1>
    %17 = vector.shape_cast %13 : vector<1x512xf32> to vector<1x512xf32>
    %18 = vector.broadcast %17 : vector<1x512xf32> to vector<8x512xf32>
    %19 = vector.shape_cast %14 : vector<1x512xf32> to vector<1x512xf32>
    %20 = vector.broadcast %19 : vector<1x512xf32> to vector<8x512xf32>
    %21 = arith.select %16, %18, %20 : vector<8x512xi1>, vector<8x512xf32>
    %22 = vector.extract_strided_slice %0 {offsets = [0, 1], sizes = [8, 1], strides = [1, 1]} : vector<8x3xi32> to vector<8x1xi32>
    %c1_i32_5 = arith.constant 1 : i32
    %23 = vector.broadcast %c1_i32_5 : i32 to vector<8x1xi32>
    %24 = arith.cmpi eq, %22, %23 : vector<8x1xi32>
    %25 = vector.extract_strided_slice %7 {offsets = [1, 0], sizes = [1, 512], strides = [1, 1]} : vector<3x512xf32> to vector<1x512xf32>
    %26 = vector.extract_strided_slice %9 {offsets = [1, 0], sizes = [1, 512], strides = [1, 1]} : vector<3x512xf32> to vector<1x512xf32>
    %27 = vector.shape_cast %24 : vector<8x1xi1> to vector<8x1xi1>
    %28 = vector.broadcast %27 : vector<8x1xi1> to vector<8x512xi1>
    %29 = vector.shape_cast %25 : vector<1x512xf32> to vector<1x512xf32>
    %30 = vector.broadcast %29 : vector<1x512xf32> to vector<8x512xf32>
    %31 = vector.shape_cast %26 : vector<1x512xf32> to vector<1x512xf32>
    %32 = vector.broadcast %31 : vector<1x512xf32> to vector<8x512xf32>
    %33 = arith.select %28, %30, %32 : vector<8x512xi1>, vector<8x512xf32>
    %34 = arith.mulf %21, %33 : vector<8x512xf32>
    %35 = vector.extract_strided_slice %0 {offsets = [0, 2], sizes = [8, 1], strides = [1, 1]} : vector<8x3xi32> to vector<8x1xi32>
    %c1_i32_6 = arith.constant 1 : i32
    %36 = vector.broadcast %c1_i32_6 : i32 to vector<8x1xi32>
    %37 = arith.cmpi eq, %35, %36 : vector<8x1xi32>
    %38 = vector.extract_strided_slice %7 {offsets = [2, 0], sizes = [1, 512], strides = [1, 1]} : vector<3x512xf32> to vector<1x512xf32>
    %39 = vector.extract_strided_slice %9 {offsets = [2, 0], sizes = [1, 512], strides = [1, 1]} : vector<3x512xf32> to vector<1x512xf32>
    %40 = vector.shape_cast %37 : vector<8x1xi1> to vector<8x1xi1>
    %41 = vector.broadcast %40 : vector<8x1xi1> to vector<8x512xi1>
    %42 = vector.shape_cast %38 : vector<1x512xf32> to vector<1x512xf32>
    %43 = vector.broadcast %42 : vector<1x512xf32> to vector<8x512xf32>
    %44 = vector.shape_cast %39 : vector<1x512xf32> to vector<1x512xf32>
    %45 = vector.broadcast %44 : vector<1x512xf32> to vector<8x512xf32>
    %46 = arith.select %41, %43, %45 : vector<8x512xi1>, vector<8x512xf32>
    %47 = arith.mulf %34, %46 : vector<8x512xf32>
    %c0_7 = arith.constant 0 : index
    %c0_8 = arith.constant 0 : index
    %48 = vector.load %arg3[%c0_7, %c0_8] : memref<64x512xbf16, #tpu.memory_space<vmem>>, vector<8x512xbf16>
    %49 = arith.extf %48 : vector<8x512xbf16> to vector<8x512xf32>
    %c32 = arith.constant 32 : index
    %c0_9 = arith.constant 0 : index
    %50 = vector.load %arg3[%c32, %c0_9] : memref<64x512xbf16, #tpu.memory_space<vmem>>, vector<8x512xbf16>
    %51 = arith.extf %50 : vector<8x512xbf16> to vector<8x512xf32>
    %52 = arith.mulf %47, %49 : vector<8x512xf32>
    %cst_10 = arith.constant dense<0.000000e+00> : vector<512xf32>
    %53 = vector.multi_reduction <add>, %52, %cst_10 [0] : vector<8x512xf32> to vector<512xf32>
    %54 = vector.shape_cast %53 : vector<512xf32> to vector<1x512xf32>
    %c0_11 = arith.constant 0 : index
    %c0_12 = arith.constant 0 : index
    %55 = vector.load %arg4[%c0_11, %c0_12] : memref<8x512xf32, #tpu.memory_space<vmem>>, vector<1x512xf32>
    tpu.vector_store %arg4[%c0_11, %c0_12], %54 {strides = array<i32>} : memref<8x512xf32, #tpu.memory_space<vmem>>, vector<1x512xf32>,
    %56 = arith.mulf %47, %51 : vector<8x512xf32>
    %cst_13 = arith.constant dense<0.000000e+00> : vector<512xf32>
    %57 = vector.multi_reduction <add>, %56, %cst_13 [0] : vector<8x512xf32> to vector<512xf32>
    %58 = vector.shape_cast %57 : vector<512xf32> to vector<1x512xf32>
    %c1 = arith.constant 1 : index
    %c0_14 = arith.constant 0 : index
    %59 = vector.load %arg4[%c1, %c0_14] : memref<8x512xf32, #tpu.memory_space<vmem>>, vector<1x512xf32>
    tpu.vector_store %arg4[%c1, %c0_14], %58 {strides = array<i32>} : memref<8x512xf32, #tpu.memory_space<vmem>>, vector<1x512xf32>,
    %cst_15 = arith.constant 1.700000e+01 : f32
    %60 = vector.broadcast %cst_15 : f32 to vector<3x512xf32>
    %61 = arith.mulf %1, %60 : vector<3x512xf32>
    %cst_16 = arith.constant 5.000000e-01 : f32
    %62 = vector.broadcast %cst_16 : f32 to vector<3x512xf32>
    %63 = arith.addf %61, %62 : vector<3x512xf32>
    %64 = math.floor %63 : vector<3x512xf32>
    %65 = arith.subf %63, %64 : vector<3x512xf32>
    %cst_17 = arith.constant 1.000000e+00 : f32
    %66 = vector.broadcast %cst_17 : f32 to vector<3x512xf32>
    %67 = arith.subf %66, %65 : vector<3x512xf32>
    %68 = vector.extract_strided_slice %0 {offsets = [0, 0], sizes = [8, 1], strides = [1, 1]} : vector<8x3xi32> to vector<8x1xi32>
    %c1_i32_18 = arith.constant 1 : i32
    %69 = vector.broadcast %c1_i32_18 : i32 to vector<8x1xi32>
    %70 = arith.cmpi eq, %68, %69 : vector<8x1xi32>
    %71 = vector.extract_strided_slice %65 {offsets = [0, 0], sizes = [1, 512], strides = [1, 1]} : vector<3x512xf32> to vector<1x512xf32>
    %72 = vector.extract_strided_slice %67 {offsets = [0, 0], sizes = [1, 512], strides = [1, 1]} : vector<3x512xf32> to vector<1x512xf32>
    %73 = vector.shape_cast %70 : vector<8x1xi1> to vector<8x1xi1>
    %74 = vector.broadcast %73 : vector<8x1xi1> to vector<8x512xi1>
    %75 = vector.shape_cast %71 : vector<1x512xf32> to vector<1x512xf32>
    %76 = vector.broadcast %75 : vector<1x512xf32> to vector<8x512xf32>
    %77 = vector.shape_cast %72 : vector<1x512xf32> to vector<1x512xf32>
    %78 = vector.broadcast %77 : vector<1x512xf32> to vector<8x512xf32>
    %79 = arith.select %74, %76, %78 : vector<8x512xi1>, vector<8x512xf32>
    %80 = vector.extract_strided_slice %0 {offsets = [0, 1], sizes = [8, 1], strides = [1, 1]} : vector<8x3xi32> to vector<8x1xi32>
    %c1_i32_19 = arith.constant 1 : i32
    %81 = vector.broadcast %c1_i32_19 : i32 to vector<8x1xi32>
    %82 = arith.cmpi eq, %80, %81 : vector<8x1xi32>
    %83 = vector.extract_strided_slice %65 {offsets = [1, 0], sizes = [1, 512], strides = [1, 1]} : vector<3x512xf32> to vector<1x512xf32>
    %84 = vector.extract_strided_slice %67 {offsets = [1, 0], sizes = [1, 512], strides = [1, 1]} : vector<3x512xf32> to vector<1x512xf32>
    %85 = vector.shape_cast %82 : vector<8x1xi1> to vector<8x1xi1>
    %86 = vector.broadcast %85 : vector<8x1xi1> to vector<8x512xi1>
    %87 = vector.shape_cast %83 : vector<1x512xf32> to vector<1x512xf32>
    %88 = vector.broadcast %87 : vector<1x512xf32> to vector<8x512xf32>
    %89 = vector.shape_cast %84 : vector<1x512xf32> to vector<1x512xf32>
    %90 = vector.broadcast %89 : vector<1x512xf32> to vector<8x512xf32>
    %91 = arith.select %86, %88, %90 : vector<8x512xi1>, vector<8x512xf32>
    %92 = arith.mulf %79, %91 : vector<8x512xf32>
    %93 = vector.extract_strided_slice %0 {offsets = [0, 2], sizes = [8, 1], strides = [1, 1]} : vector<8x3xi32> to vector<8x1xi32>
    %c1_i32_20 = arith.constant 1 : i32
    %94 = vector.broadcast %c1_i32_20 : i32 to vector<8x1xi32>
    %95 = arith.cmpi eq, %93, %94 : vector<8x1xi32>
    %96 = vector.extract_strided_slice %65 {offsets = [2, 0], sizes = [1, 512], strides = [1, 1]} : vector<3x512xf32> to vector<1x512xf32>
    %97 = vector.extract_strided_slice %67 {offsets = [2, 0], sizes = [1, 512], strides = [1, 1]} : vector<3x512xf32> to vector<1x512xf32>
    %98 = vector.shape_cast %95 : vector<8x1xi1> to vector<8x1xi1>
    %99 = vector.broadcast %98 : vector<8x1xi1> to vector<8x512xi1>
    %100 = vector.shape_cast %96 : vector<1x512xf32> to vector<1x512xf32>
    %101 = vector.broadcast %100 : vector<1x512xf32> to vector<8x512xf32>
    %102 = vector.shape_cast %97 : vector<1x512xf32> to vector<1x512xf32>
    %103 = vector.broadcast %102 : vector<1x512xf32> to vector<8x512xf32>
    %104 = arith.select %99, %101, %103 : vector<8x512xi1>, vector<8x512xf32>
    %105 = arith.mulf %92, %104 : vector<8x512xf32>
    %c8 = arith.constant 8 : index
    %c0_21 = arith.constant 0 : index
    %106 = vector.load %arg3[%c8, %c0_21] : memref<64x512xbf16, #tpu.memory_space<vmem>>, vector<8x512xbf16>
    %107 = arith.extf %106 : vector<8x512xbf16> to vector<8x512xf32>
    %c40 = arith.constant 40 : index
    %c0_22 = arith.constant 0 : index
    %108 = vector.load %arg3[%c40, %c0_22] : memref<64x512xbf16, #tpu.memory_space<vmem>>, vector<8x512xbf16>
    %109 = arith.extf %108 : vector<8x512xbf16> to vector<8x512xf32>
    %110 = arith.mulf %105, %107 : vector<8x512xf32>
    %cst_23 = arith.constant dense<0.000000e+00> : vector<512xf32>
    %111 = vector.multi_reduction <add>, %110, %cst_23 [0] : vector<8x512xf32> to vector<512xf32>
    %112 = vector.shape_cast %111 : vector<512xf32> to vector<1x512xf32>
    %c2 = arith.constant 2 : index
    %c0_24 = arith.constant 0 : index
    %113 = vector.load %arg4[%c2, %c0_24] : memref<8x512xf32, #tpu.memory_space<vmem>>, vector<1x512xf32>
    tpu.vector_store %arg4[%c2, %c0_24], %112 {strides = array<i32>} : memref<8x512xf32, #tpu.memory_space<vmem>>, vector<1x512xf32>,
    %114 = arith.mulf %105, %109 : vector<8x512xf32>
    %cst_25 = arith.constant dense<0.000000e+00> : vector<512xf32>
    %115 = vector.multi_reduction <add>, %114, %cst_25 [0] : vector<8x512xf32> to vector<512xf32>
    %116 = vector.shape_cast %115 : vector<512xf32> to vector<1x512xf32>
    %c3 = arith.constant 3 : index
    %c0_26 = arith.constant 0 : index
    %117 = vector.load %arg4[%c3, %c0_26] : memref<8x512xf32, #tpu.memory_space<vmem>>, vector<1x512xf32>
    tpu.vector_store %arg4[%c3, %c0_26], %116 {strides = array<i32>} : memref<8x512xf32, #tpu.memory_space<vmem>>, vector<1x512xf32>,
    %cst_27 = arith.constant 2.600000e+01 : f32
    %118 = vector.broadcast %cst_27 : f32 to vector<3x512xf32>
    %119 = arith.mulf %1, %118 : vector<3x512xf32>
    %cst_28 = arith.constant 5.000000e-01 : f32
    %120 = vector.broadcast %cst_28 : f32 to vector<3x512xf32>
    %121 = arith.addf %119, %120 : vector<3x512xf32>
    %122 = math.floor %121 : vector<3x512xf32>
    %123 = arith.subf %121, %122 : vector<3x512xf32>
    %cst_29 = arith.constant 1.000000e+00 : f32
    %124 = vector.broadcast %cst_29 : f32 to vector<3x512xf32>
    %125 = arith.subf %124, %123 : vector<3x512xf32>
    %126 = vector.extract_strided_slice %0 {offsets = [0, 0], sizes = [8, 1], strides = [1, 1]} : vector<8x3xi32> to vector<8x1xi32>
    %c1_i32_30 = arith.constant 1 : i32
    %127 = vector.broadcast %c1_i32_30 : i32 to vector<8x1xi32>
    %128 = arith.cmpi eq, %126, %127 : vector<8x1xi32>
    %129 = vector.extract_strided_slice %123 {offsets = [0, 0], sizes = [1, 512], strides = [1, 1]} : vector<3x512xf32> to vector<1x512xf32>
    %130 = vector.extract_strided_slice %125 {offsets = [0, 0], sizes = [1, 512], strides = [1, 1]} : vector<3x512xf32> to vector<1x512xf32>
    %131 = vector.shape_cast %128 : vector<8x1xi1> to vector<8x1xi1>
    %132 = vector.broadcast %131 : vector<8x1xi1> to vector<8x512xi1>
    %133 = vector.shape_cast %129 : vector<1x512xf32> to vector<1x512xf32>
    %134 = vector.broadcast %133 : vector<1x512xf32> to vector<8x512xf32>
    %135 = vector.shape_cast %130 : vector<1x512xf32> to vector<1x512xf32>
    %136 = vector.broadcast %135 : vector<1x512xf32> to vector<8x512xf32>
    %137 = arith.select %132, %134, %136 : vector<8x512xi1>, vector<8x512xf32>
    %138 = vector.extract_strided_slice %0 {offsets = [0, 1], sizes = [8, 1], strides = [1, 1]} : vector<8x3xi32> to vector<8x1xi32>
    %c1_i32_31 = arith.constant 1 : i32
    %139 = vector.broadcast %c1_i32_31 : i32 to vector<8x1xi32>
    %140 = arith.cmpi eq, %138, %139 : vector<8x1xi32>
    %141 = vector.extract_strided_slice %123 {offsets = [1, 0], sizes = [1, 512], strides = [1, 1]} : vector<3x512xf32> to vector<1x512xf32>
    %142 = vector.extract_strided_slice %125 {offsets = [1, 0], sizes = [1, 512], strides = [1, 1]} : vector<3x512xf32> to vector<1x512xf32>
    %143 = vector.shape_cast %140 : vector<8x1xi1> to vector<8x1xi1>
    %144 = vector.broadcast %143 : vector<8x1xi1> to vector<8x512xi1>
    %145 = vector.shape_cast %141 : vector<1x512xf32> to vector<1x512xf32>
    %146 = vector.broadcast %145 : vector<1x512xf32> to vector<8x512xf32>
    %147 = vector.shape_cast %142 : vector<1x512xf32> to vector<1x512xf32>
    %148 = vector.broadcast %147 : vector<1x512xf32> to vector<8x512xf32>
    %149 = arith.select %144, %146, %148 : vector<8x512xi1>, vector<8x512xf32>
    %150 = arith.mulf %137, %149 : vector<8x512xf32>
    %151 = vector.extract_strided_slice %0 {offsets = [0, 2], sizes = [8, 1], strides = [1, 1]} : vector<8x3xi32> to vector<8x1xi32>
    %c1_i32_32 = arith.constant 1 : i32
    %152 = vector.broadcast %c1_i32_32 : i32 to vector<8x1xi32>
    %153 = arith.cmpi eq, %151, %152 : vector<8x1xi32>
    %154 = vector.extract_strided_slice %123 {offsets = [2, 0], sizes = [1, 512], strides = [1, 1]} : vector<3x512xf32> to vector<1x512xf32>
    %155 = vector.extract_strided_slice %125 {offsets = [2, 0], sizes = [1, 512], strides = [1, 1]} : vector<3x512xf32> to vector<1x512xf32>
    %156 = vector.shape_cast %153 : vector<8x1xi1> to vector<8x1xi1>
    %157 = vector.broadcast %156 : vector<8x1xi1> to vector<8x512xi1>
    %158 = vector.shape_cast %154 : vector<1x512xf32> to vector<1x512xf32>
    %159 = vector.broadcast %158 : vector<1x512xf32> to vector<8x512xf32>
    %160 = vector.shape_cast %155 : vector<1x512xf32> to vector<1x512xf32>
    %161 = vector.broadcast %160 : vector<1x512xf32> to vector<8x512xf32>
    %162 = arith.select %157, %159, %161 : vector<8x512xi1>, vector<8x512xf32>
    %163 = arith.mulf %150, %162 : vector<8x512xf32>
    %c16 = arith.constant 16 : index
    %c0_33 = arith.constant 0 : index
    %164 = vector.load %arg3[%c16, %c0_33] : memref<64x512xbf16, #tpu.memory_space<vmem>>, vector<8x512xbf16>
    %165 = arith.extf %164 : vector<8x512xbf16> to vector<8x512xf32>
    %c48 = arith.constant 48 : index
    %c0_34 = arith.constant 0 : index
    %166 = vector.load %arg3[%c48, %c0_34] : memref<64x512xbf16, #tpu.memory_space<vmem>>, vector<8x512xbf16>
    %167 = arith.extf %166 : vector<8x512xbf16> to vector<8x512xf32>
    %168 = arith.mulf %163, %165 : vector<8x512xf32>
    %cst_35 = arith.constant dense<0.000000e+00> : vector<512xf32>
    %169 = vector.multi_reduction <add>, %168, %cst_35 [0] : vector<8x512xf32> to vector<512xf32>
    %170 = vector.shape_cast %169 : vector<512xf32> to vector<1x512xf32>
    %c4 = arith.constant 4 : index
    %c0_36 = arith.constant 0 : index
    %171 = vector.load %arg4[%c4, %c0_36] : memref<8x512xf32, #tpu.memory_space<vmem>>, vector<1x512xf32>
    tpu.vector_store %arg4[%c4, %c0_36], %170 {strides = array<i32>} : memref<8x512xf32, #tpu.memory_space<vmem>>, vector<1x512xf32>,
    %172 = arith.mulf %163, %167 : vector<8x512xf32>
    %cst_37 = arith.constant dense<0.000000e+00> : vector<512xf32>
    %173 = vector.multi_reduction <add>, %172, %cst_37 [0] : vector<8x512xf32> to vector<512xf32>
    %174 = vector.shape_cast %173 : vector<512xf32> to vector<1x512xf32>
    %c5 = arith.constant 5 : index
    %c0_38 = arith.constant 0 : index
    %175 = vector.load %arg4[%c5, %c0_38] : memref<8x512xf32, #tpu.memory_space<vmem>>, vector<1x512xf32>
    tpu.vector_store %arg4[%c5, %c0_38], %174 {strides = array<i32>} : memref<8x512xf32, #tpu.memory_space<vmem>>, vector<1x512xf32>,
    %cst_39 = arith.constant 3.950000e+01 : f32
    %176 = vector.broadcast %cst_39 : f32 to vector<3x512xf32>
    %177 = arith.mulf %1, %176 : vector<3x512xf32>
    %cst_40 = arith.constant 5.000000e-01 : f32
    %178 = vector.broadcast %cst_40 : f32 to vector<3x512xf32>
    %179 = arith.addf %177, %178 : vector<3x512xf32>
    %180 = math.floor %179 : vector<3x512xf32>
    %181 = arith.subf %179, %180 : vector<3x512xf32>
    %cst_41 = arith.constant 1.000000e+00 : f32
    %182 = vector.broadcast %cst_41 : f32 to vector<3x512xf32>
    %183 = arith.subf %182, %181 : vector<3x512xf32>
    %184 = vector.extract_strided_slice %0 {offsets = [0, 0], sizes = [8, 1], strides = [1, 1]} : vector<8x3xi32> to vector<8x1xi32>
    %c1_i32_42 = arith.constant 1 : i32
    %185 = vector.broadcast %c1_i32_42 : i32 to vector<8x1xi32>
    %186 = arith.cmpi eq, %184, %185 : vector<8x1xi32>
    %187 = vector.extract_strided_slice %181 {offsets = [0, 0], sizes = [1, 512], strides = [1, 1]} : vector<3x512xf32> to vector<1x512xf32>
    %188 = vector.extract_strided_slice %183 {offsets = [0, 0], sizes = [1, 512], strides = [1, 1]} : vector<3x512xf32> to vector<1x512xf32>
    %189 = vector.shape_cast %186 : vector<8x1xi1> to vector<8x1xi1>
    %190 = vector.broadcast %189 : vector<8x1xi1> to vector<8x512xi1>
    %191 = vector.shape_cast %187 : vector<1x512xf32> to vector<1x512xf32>
    %192 = vector.broadcast %191 : vector<1x512xf32> to vector<8x512xf32>
    %193 = vector.shape_cast %188 : vector<1x512xf32> to vector<1x512xf32>
    %194 = vector.broadcast %193 : vector<1x512xf32> to vector<8x512xf32>
    %195 = arith.select %190, %192, %194 : vector<8x512xi1>, vector<8x512xf32>
    %196 = vector.extract_strided_slice %0 {offsets = [0, 1], sizes = [8, 1], strides = [1, 1]} : vector<8x3xi32> to vector<8x1xi32>
    %c1_i32_43 = arith.constant 1 : i32
    %197 = vector.broadcast %c1_i32_43 : i32 to vector<8x1xi32>
    %198 = arith.cmpi eq, %196, %197 : vector<8x1xi32>
    %199 = vector.extract_strided_slice %181 {offsets = [1, 0], sizes = [1, 512], strides = [1, 1]} : vector<3x512xf32> to vector<1x512xf32>
    %200 = vector.extract_strided_slice %183 {offsets = [1, 0], sizes = [1, 512], strides = [1, 1]} : vector<3x512xf32> to vector<1x512xf32>
    %201 = vector.shape_cast %198 : vector<8x1xi1> to vector<8x1xi1>
    %202 = vector.broadcast %201 : vector<8x1xi1> to vector<8x512xi1>
    %203 = vector.shape_cast %199 : vector<1x512xf32> to vector<1x512xf32>
    %204 = vector.broadcast %203 : vector<1x512xf32> to vector<8x512xf32>
    %205 = vector.shape_cast %200 : vector<1x512xf32> to vector<1x512xf32>
    %206 = vector.broadcast %205 : vector<1x512xf32> to vector<8x512xf32>
    %207 = arith.select %202, %204, %206 : vector<8x512xi1>, vector<8x512xf32>
    %208 = arith.mulf %195, %207 : vector<8x512xf32>
    %209 = vector.extract_strided_slice %0 {offsets = [0, 2], sizes = [8, 1], strides = [1, 1]} : vector<8x3xi32> to vector<8x1xi32>
    %c1_i32_44 = arith.constant 1 : i32
    %210 = vector.broadcast %c1_i32_44 : i32 to vector<8x1xi32>
    %211 = arith.cmpi eq, %209, %210 : vector<8x1xi32>
    %212 = vector.extract_strided_slice %181 {offsets = [2, 0], sizes = [1, 512], strides = [1, 1]} : vector<3x512xf32> to vector<1x512xf32>
    %213 = vector.extract_strided_slice %183 {offsets = [2, 0], sizes = [1, 512], strides = [1, 1]} : vector<3x512xf32> to vector<1x512xf32>
    %214 = vector.shape_cast %211 : vector<8x1xi1> to vector<8x1xi1>
    %215 = vector.broadcast %214 : vector<8x1xi1> to vector<8x512xi1>
    %216 = vector.shape_cast %212 : vector<1x512xf32> to vector<1x512xf32>
    %217 = vector.broadcast %216 : vector<1x512xf32> to vector<8x512xf32>
    %218 = vector.shape_cast %213 : vector<1x512xf32> to vector<1x512xf32>
    %219 = vector.broadcast %218 : vector<1x512xf32> to vector<8x512xf32>
    %220 = arith.select %215, %217, %219 : vector<8x512xi1>, vector<8x512xf32>
    %221 = arith.mulf %208, %220 : vector<8x512xf32>
    %c24 = arith.constant 24 : index
    %c0_45 = arith.constant 0 : index
    %222 = vector.load %arg3[%c24, %c0_45] : memref<64x512xbf16, #tpu.memory_space<vmem>>, vector<8x512xbf16>
    %223 = arith.extf %222 : vector<8x512xbf16> to vector<8x512xf32>
    %c56 = arith.constant 56 : index
    %c0_46 = arith.constant 0 : index
    %224 = vector.load %arg3[%c56, %c0_46] : memref<64x512xbf16, #tpu.memory_space<vmem>>, vector<8x512xbf16>
    %225 = arith.extf %224 : vector<8x512xbf16> to vector<8x512xf32>
    %226 = arith.mulf %221, %223 : vector<8x512xf32>
    %cst_47 = arith.constant dense<0.000000e+00> : vector<512xf32>
    %227 = vector.multi_reduction <add>, %226, %cst_47 [0] : vector<8x512xf32> to vector<512xf32>
    %228 = vector.shape_cast %227 : vector<512xf32> to vector<1x512xf32>
    %c6 = arith.constant 6 : index
    %c0_48 = arith.constant 0 : index
    %229 = vector.load %arg4[%c6, %c0_48] : memref<8x512xf32, #tpu.memory_space<vmem>>, vector<1x512xf32>
    tpu.vector_store %arg4[%c6, %c0_48], %228 {strides = array<i32>} : memref<8x512xf32, #tpu.memory_space<vmem>>, vector<1x512xf32>,
    %230 = arith.mulf %221, %225 : vector<8x512xf32>
    %cst_49 = arith.constant dense<0.000000e+00> : vector<512xf32>
    %231 = vector.multi_reduction <add>, %230, %cst_49 [0] : vector<8x512xf32> to vector<512xf32>
    %232 = vector.shape_cast %231 : vector<512xf32> to vector<1x512xf32>
    %c7 = arith.constant 7 : index
    %c0_50 = arith.constant 0 : index
    %233 = vector.load %arg4[%c7, %c0_50] : memref<8x512xf32, #tpu.memory_space<vmem>>, vector<1x512xf32>
    tpu.vector_store %arg4[%c7, %c0_50], %232 {strides = array<i32>} : memref<8x512xf32, #tpu.memory_space<vmem>>, vector<1x512xf32>,
    return
  }
  func.func @transform_0(%arg0: i32) -> (i32, i32) {
    %c0_i32 = arith.constant 0 : i32
    %c0_i32_0 = arith.constant 0 : i32
    %c0_i32_1 = arith.constant 0 : i32
    return %c0_i32, %c0_i32_0 : i32, i32
  }
  func.func @transform_1(%arg0: i32) -> (i32, i32) {
    %c0_i32 = arith.constant 0 : i32
    %c0_i32_0 = arith.constant 0 : i32
    return %c0_i32, %arg0 : i32, i32
  }
  func.func @transform_2(%arg0: i32) -> (i32, i32) {
    %c0_i32 = arith.constant 0 : i32
    %c0_i32_0 = arith.constant 0 : i32
    return %c0_i32, %arg0 : i32, i32
  }
  func.func @transform_3(%arg0: i32) -> (i32, i32) {
    %c0_i32 = arith.constant 0 : i32
    %c0_i32_0 = arith.constant 0 : i32
    return %c0_i32, %arg0 : i32, i32
  }
}

</mosaic_0001>

<bundles_post_ra>
// kernel: _lambda_.2
= control target key start
LH: loop header
LB: loop body
LE: loop exit
PB: predicated region body
PF: predicated region fallthrough
CT: control target
= control target key end

     0   :  { %s971_s9 = smov 0   ;;  %s973_s10 = smov 0   ;;  %s1426_s0 = inlined_call_operand.vmem [shape: s32[8,3], index: 0, kind: input, shape index: {}]   ;;  %s1427_s1 = inlined_call_operand.vmem [shape: f32[3,1024], index: 1, kind: input, shape index: {}]   ;;  %s1428_s2 = inlined_call_operand.vmem [shape: s32[32,1024], index: 2, kind: output, shape index: {}]  }
   0x1   :  { %s975_s11 = smov 0  }
   0x2 LB: > { %s984_s12 = sadd.s32 4294967295, %s951_s11   ;;  %s986_s13 = sadd.s32 1, %s951_s11   ;;  %s951_s11 = sphi %s975_s11, %s1442_s11   ;;  %s947_s10 = sphi %s973_s10, %s1441_s10   ;;  %s943_s9 = sphi %s971_s9, %s1440_s9  }
   0x3   : > { %s63_s14 = ssub.s32 %s951_s11, %s986_s13  ;;  %s66_s15 = sadd.s32 1, %s947_s10 }
   0x4   : > { %p64_p0 = scmp.eq.s32.totalorder %s63_s14, 0  ;;  %p76_p1 = scmp.ne.s32.totalorder %s947_s10, %s943_s9 }
   0x5   : > { %p77_p2 = scmp.eq.s32.totalorder %s984_s12, 1  ;;  %p860_p3 = scmp.ge.s32.totalorder %s951_s11, 1 }
   0x6   : > { %s994_s16 = scalar_select %p64_p0, %s947_s10, %s66_s15  }
   0x7   : > { %p996_p4 = por %p77_p2, %p76_p1  ;;  %p113_p5 = scmp.lt.s32.totalorder %s951_s11, 3 }
   0x9   : > { %p114_p6 = pnand %p860_p3, %p113_p5 }
   0xa   : > { %v141_v0 = vld [vmem:[%s1426_s0] sm:$0xff] (!%p114_p6)  ;;  %v953_v1 = vmov (!%p114_p6), 1   ;;  %v954_v2 = vmov (!%p114_p6), 2   ;;  %v955_v3 = vmov (!%p114_p6), 0   ;;  %s862_s20 = sshll.u32 (!%p114_p6), %s984_s12, 2  ;;  %v152_v22 = vlaneseq (!%p114_p6)  ;;  %s131_s25 = sand.u32 (!%p114_p6), 1, %s943_s9  }
   0xb   : > { %117 = sbr.rel (%p114_p6) target bundleno = 196 (0xc4), region = 28  ;;  %925 = vset.pattern.permute.xlu0 (!%p114_p6), %v953_v1  ;;  %927 = vset.pattern.permute.xlu1 (!%p114_p6), %v954_v2  ;;  %p135_p7 = scmp.lt.s32.totalorder (!%p114_p6), %s862_s20, 7 }
   0xc   : > { %224 = vperm.xlu0 (!%p114_p6), %925, %v141_v0   ;;  %271 = vperm.xlu1 (!%p114_p6), %927, %v141_v0   ;;  %v153_v31 = vshrl.u32 (!%p114_p6), %v152_v22, 7  ;;  %s861_s26 = sshll.u32 (!%p114_p6), %s131_s25, 7 }
   0xd   : > { %s1320_s27 = scalar_lea.vmem (!%p114_p6), [#allocation2], %s861_s26 }
   0xe   : > { %v240_v40 = vsub.s32 (!%p114_p6), 2, %v153_v31  ;;  %v244_v41 = vsub.s32 (!%p114_p6), 6, %v153_v31  ;;  %v1007_v42 = vsub.s32 (!%p114_p6), 0, %v153_v31  ;;  %v1009_v43 = vsub.s32 (!%p114_p6), 1, %v153_v31 }
   0xf   : > { %v1011_v44 = vsub.s32 (!%p114_p6), 4, %v153_v31  ;;  %v1013_v45 = vsub.s32 (!%p114_p6), 5, %v153_v31 }
  0x10   : > { %926 = vset.pattern.permute.xlu0 (!%p114_p6), %v955_v3 }
  0x11   : > { %185 = vperm.xlu0 (!%p114_p6), %926, %v141_v0  }
  0x12   : > { %s1444_s20 = smov (!%p135_p7, %s862_s20), 7  ;;  %s881_s28 = sshll.u32 (%p996_p4), %s984_s12, 5 }
  0x13   : > { %s863_s21 = sshll.u32 %s1444_s20, 2  ;;  %s758_s3 = scalar_lea.vmem (%p996_p4), %s1428_s2, %s881_s28 }
  0x14   : > { %s138_s24 = scalar_lea.vmem %s1427_s1, %s863_s21 }
  0x15   : > { %928 = vset.pattern.permute.xlu0 %v954_v2  ;;  %v142_v4 = vld [vmem:[%s138_s24] sm:$0x77]  ;;  %v143_v5 = vld [vmem:[%s138_s24 + $0x8] sm:$0x77] }
  0x16   : > { %v144_v6 = vmul.f32 11.0, %v142_v4  ;;  %v145_v7 = vmul.f32 11.0, %v143_v5  ;;  %v301_v8 = vmul.f32 17.0, %v142_v4  ;;  %v302_v9 = vmul.f32 17.0, %v143_v5 }
  0x17   : > { %v453_v10 = vmul.f32 26.0, %v142_v4  ;;  %v454_v11 = vmul.f32 26.0, %v143_v5  ;;  %v605_v12 = vmul.f32 39.5, %v142_v4  ;;  %v606_v13 = vmul.f32 39.5, %v143_v5 }
  0x18   : > { %v146_v14 = vadd.f32 0.5, %v144_v6  ;;  %v147_v15 = vadd.f32 0.5, %v145_v7  ;;  %v303_v16 = vadd.f32 0.5, %v301_v8  ;;  %v304_v17 = vadd.f32 0.5, %v302_v9 }
  0x19   : > { %v455_v18 = vadd.f32 0.5, %v453_v10  ;;  %v456_v19 = vadd.f32 0.5, %v454_v11  ;;  %v607_v20 = vadd.f32 0.5, %v605_v12  ;;  %v608_v21 = vadd.f32 0.5, %v606_v13 }
  0x1a   : > { %v148_v23 = vfloor.f32 %v146_v14  ;;  %v149_v24 = vfloor.f32 %v147_v15  ;;  %v305_v25 = vfloor.f32 %v303_v16  ;;  %v306_v26 = vfloor.f32 %v304_v17 }
  0x1b   : > { %v457_v27 = vfloor.f32 %v455_v18  ;;  %v458_v28 = vfloor.f32 %v456_v19  ;;  %v609_v29 = vfloor.f32 %v607_v20  ;;  %v610_v30 = vfloor.f32 %v608_v21 }
  0x1c   : > { %v882_v32 = vtrunc.f32 %v148_v23  ;;  %v884_v33 = vtrunc.f32 %v149_v24  ;;  %v886_v34 = vtrunc.f32 %v305_v25  ;;  %v888_v35 = vtrunc.f32 %v306_v26 }
  0x1d   : > { %v890_v36 = vtrunc.f32 %v457_v27  ;;  %v892_v37 = vtrunc.f32 %v458_v28  ;;  %v894_v38 = vtrunc.f32 %v609_v29  ;;  %v896_v39 = vtrunc.f32 %v610_v30 }
  0x1e   : > { %v883_v46 = vcvt.f32.s32 %v882_v32  ;;  %v1015_v47 = vcvt.f32.s32 %v884_v33  ;;  %v1017_v48 = vcvt.f32.s32 %v886_v34  ;;  %v1019_v49 = vcvt.f32.s32 %v888_v35 }
  0x1f   : > { %v1021_v50 = vcvt.f32.s32 %v890_v36  ;;  %v1023_v51 = vcvt.f32.s32 %v892_v37  ;;  %v1025_v52 = vcvt.f32.s32 %v894_v38  ;;  %v1027_v53 = vcvt.f32.s32 %v896_v39 }
  0x20   : > { %v241_v54 = vrot.slane %v883_v46, %v240_v40  ;;  %v245_v55 = vrot.slane %v883_v46, %v244_v41  ;;  %v249_v56 = vrot.slane %v1015_v47, %v240_v40  ;;  %v253_v57 = vrot.slane %v1015_v47, %v244_v41 }
  0x21   : > { %v392_v58 = vrot.slane %v1017_v48, %v240_v40  ;;  %v396_v59 = vrot.slane %v1017_v48, %v244_v41  ;;  %v400_v60 = vrot.slane %v1019_v49, %v240_v40  ;;  %v404_v61 = vrot.slane %v1019_v49, %v244_v41 }
  0x22   : > { %v544_v62 = vrot.slane %v1021_v50, %v240_v40  ;;  %v548_v63 = vrot.slane %v1021_v50, %v244_v41  ;;  %v552_v0 = vrot.slane %v1023_v51, %v240_v40  ;;  %v556_v1 = vrot.slane %v1023_v51, %v244_v41 }
  0x23   : > { %v696_v2 = vrot.slane %v1025_v52, %v240_v40  ;;  %v700_v3 = vrot.slane %v1025_v52, %v244_v41  ;;  %v704_v4 = vrot.slane %v1027_v53, %v240_v40  ;;  %v708_v5 = vrot.slane %v1027_v53, %v244_v41 }
  0x24   : > { %v1043_v6 = vrot.slane %v241_v54, %v240_v40  ;;  %v1045_v7 = vrot.slane %v245_v55, %v240_v40  ;;  %v1047_v8 = vrot.slane %v249_v56, %v240_v40  ;;  %v1049_v9 = vrot.slane %v253_v57, %v240_v40 }
  0x25   : > { %v1051_v10 = vrot.slane %v392_v58, %v240_v40  ;;  %v1053_v11 = vrot.slane %v396_v59, %v240_v40  ;;  %v1055_v12 = vrot.slane %v400_v60, %v240_v40  ;;  %v1057_v13 = vrot.slane %v404_v61, %v240_v40 }
  0x26   : > { %v1059_v14 = vrot.slane %v544_v62, %v240_v40  ;;  %v1061_v15 = vrot.slane %v548_v63, %v240_v40  ;;  %v1063_v16 = vrot.slane %v552_v0, %v240_v40  ;;  %v1065_v17 = vrot.slane %v556_v1, %v240_v40 }
  0x27   : > { %v1067_v18 = vrot.slane %v696_v2, %v240_v40  ;;  %v1069_v19 = vrot.slane %v700_v3, %v240_v40  ;;  %v1071_v20 = vrot.slane %v704_v4, %v240_v40  ;;  %v1073_v21 = vrot.slane %v708_v5, %v240_v40 }
  0x28   : > { %v155_v22 = vrot.slane %v883_v46, %v1007_v42  ;;  %v159_v23 = vrot.slane %v883_v46, %v1011_v44  ;;  %v163_v24 = vrot.slane %v1015_v47, %v1007_v42  ;;  %v167_v25 = vrot.slane %v1015_v47, %v1011_v44 }
  0x29   : > { %v194_v26 = vrot.slane %v883_v46, %v1009_v43  ;;  %v198_v27 = vrot.slane %v883_v46, %v1013_v45  ;;  %v202_v28 = vrot.slane %v1015_v47, %v1009_v43  ;;  %v206_v29 = vrot.slane %v1015_v47, %v1013_v45 }
  0x2a   : > { %v312_v30 = vrot.slane %v1017_v48, %v1007_v42  ;;  %v316_v31 = vrot.slane %v1017_v48, %v1011_v44  ;;  %v320_v32 = vrot.slane %v1019_v49, %v1007_v42  ;;  %v324_v33 = vrot.slane %v1019_v49, %v1011_v44 }
  0x2b   : > { %v348_v34 = vrot.slane %v1017_v48, %v1009_v43  ;;  %v352_v35 = vrot.slane %v1017_v48, %v1013_v45  ;;  %v356_v36 = vrot.slane %v1019_v49, %v1009_v43  ;;  %v360_v37 = vrot.slane %v1019_v49, %v1013_v45 }
  0x2c   : > { %v1104_v38 = vrot.slane %v155_v22, %v1007_v42  ;;  %v1107_v39 = vrot.slane %v159_v23, %v1007_v42  ;;  %v1110_v40 = vrot.slane %v163_v24, %v1007_v42  ;;  %v1113_v41 = vrot.slane %v167_v25, %v1007_v42 }
  0x2d   : > { %v1116_v46 = vrot.slane %v194_v26, %v1009_v43  ;;  %v1119_v47 = vrot.slane %v198_v27, %v1009_v43  ;;  %v1122_v48 = vrot.slane %v202_v28, %v1009_v43  ;;  %v1125_v49 = vrot.slane %v206_v29, %v1009_v43 }
  0x2e   : > { %v1128_v54 = vrot.slane %v312_v30, %v1007_v42  ;;  %v1131_v55 = vrot.slane %v316_v31, %v1007_v42  ;;  %v1134_v56 = vrot.slane %v320_v32, %v1007_v42  ;;  %v1137_v57 = vrot.slane %v324_v33, %v1007_v42 }
  0x2f   : > { %v1140_v58 = vrot.slane %v348_v34, %v1009_v43  ;;  %v1143_v59 = vrot.slane %v352_v35, %v1009_v43  ;;  %v1146_v60 = vrot.slane %v356_v36, %v1009_v43  ;;  %v1149_v61 = vrot.slane %v360_v37, %v1009_v43 }
  0x30   : > { %v464_v62 = vrot.slane %v1021_v50, %v1007_v42  ;;  %v468_v63 = vrot.slane %v1021_v50, %v1011_v44  ;;  %v472_v0 = vrot.slane %v1023_v51, %v1007_v42  ;;  %v476_v1 = vrot.slane %v1023_v51, %v1011_v44 }
  0x31   : > { %v500_v2 = vrot.slane %v1021_v50, %v1009_v43  ;;  %v504_v3 = vrot.slane %v1021_v50, %v1013_v45  ;;  %v508_v4 = vrot.slane %v1023_v51, %v1009_v43  ;;  %v512_v5 = vrot.slane %v1023_v51, %v1013_v45 }
  0x32   : > { %v616_v22 = vrot.slane %v1025_v52, %v1007_v42  ;;  %v620_v23 = vrot.slane %v1025_v52, %v1011_v44  ;;  %v624_v24 = vrot.slane %v1027_v53, %v1007_v42  ;;  %v628_v25 = vrot.slane %v1027_v53, %v1011_v44 }
  0x33   : > { %v652_v50 = vrot.slane %v1025_v52, %v1009_v43  ;;  %v656_v26 = vrot.slane %v1025_v52, %v1013_v45  ;;  %v660_v51 = vrot.slane %v1027_v53, %v1009_v43  ;;  %v664_v27 = vrot.slane %v1027_v53, %v1013_v45 }
  0x34   : > { %v1184_v28 = vrot.slane %v464_v62, %v1007_v42  ;;  %v1187_v29 = vrot.slane %v468_v63, %v1007_v42  ;;  %v1190_v44 = vrot.slane %v472_v0, %v1007_v42  ;;  %v1193_v30 = vrot.slane %v476_v1, %v1007_v42 }
  0x35   : > { %v1196_v52 = vrot.slane %v500_v2, %v1009_v43  ;;  %v1199_v31 = vrot.slane %v504_v3, %v1009_v43  ;;  %v1202_v45 = vrot.slane %v508_v4, %v1009_v43  ;;  %v1205_v53 = vrot.slane %v512_v5, %v1009_v43 }
  0x36   : > { %v1208_v32 = vrot.slane %v616_v22, %v1007_v42  ;;  %v1211_v33 = vrot.slane %v620_v23, %v1007_v42  ;;  %v1214_v34 = vrot.slane %v624_v24, %v1007_v42  ;;  %v1217_v35 = vrot.slane %v628_v25, %v1007_v42 }
  0x37   : > { %v1222_v62 = vrot.slane %v652_v50, %v1009_v43  ;;  %v1225_v63 = vrot.slane %v656_v26, %v1009_v43  ;;  %v1228_v0 = vrot.slane %v660_v51, %v1009_v43  ;;  %v1231_v1 = vrot.slane %v664_v27, %v1009_v43 }
  0x8b   : > { %v1219_v36 = vpop.permute.xlu0 %224  ;;  %v272_v37 = vpop.permute.xlu1 %271 }
  0x8c   : > { %v273_v2 = vadd.s32 %v272_v37, %v1043_v6  ;;  %v274_v42 = vadd.s32 %v272_v37, %v1045_v7  ;;  %v275_v3 = vadd.s32 %v272_v37, %v1047_v8  ;;  %v276_v4 = vadd.s32 %v272_v37, %v1049_v9 }
  0x8d   : > { %v1238_v5 = vadd.s32 %v1051_v10, %v272_v37  ;;  %v1241_v22 = vadd.s32 %v1053_v11, %v272_v37  ;;  %v1244_v23 = vadd.s32 %v1055_v12, %v272_v37  ;;  %v1247_v43 = vadd.s32 %v1057_v13, %v272_v37 }
  0x8e   : > { %v277_v24 = vmul.u32 144, %v273_v2  ;;  %v278_v6 = vmul.u32 144, %v274_v42  ;;  %v1250_v7 = vadd.s32 %v1059_v14, %v272_v37  ;;  %v1253_v8 = vadd.s32 %v1061_v15, %v272_v37 }
  0x8f   : > { %v279_v9 = vmul.u32 144, %v275_v3  ;;  %v280_v10 = vmul.u32 144, %v276_v4  ;;  %v1256_v25 = vadd.s32 %v1063_v16, %v272_v37  ;;  %v1259_v11 = vadd.s32 %v1065_v17, %v272_v37 }
  0x90   : > { %v425_v12 = vmul.u32 324, %v1238_v5  ;;  %v426_v13 = vmul.u32 324, %v1241_v22  ;;  %v1264_v50 = vadd.s32 %v1067_v18, %v272_v37  ;;  %v1267_v14 = vadd.s32 %v1069_v19, %v272_v37  ;;  %v1269_v15 = vpop.permute.xlu0 %185 }
  0x91   : > { %v1274_v51 = vadd.s32 %v1071_v20, %v272_v37  ;;  %v1277_v17 = vadd.s32 %v1073_v21, %v272_v37  ;;  %v187_v19 = vadd.s32 %v1269_v15, %v1104_v38  ;;  %v188_v2 = vadd.s32 %v1269_v15, %v1107_v39 }
  0x92   : > { %v189_v20 = vadd.s32 %v1269_v15, %v1110_v40  ;;  %v190_v21 = vadd.s32 %v1269_v15, %v1113_v41  ;;  %v226_v38 = vadd.s32 %v1219_v36, %v1116_v46  ;;  %v227_v39 = vadd.s32 %v1219_v36, %v1119_v47 }
  0x93   : > { %v228_v40 = vadd.s32 %v1219_v36, %v1122_v48  ;;  %v229_v41 = vadd.s32 %v1219_v36, %v1125_v49  ;;  %v341_v4 = vadd.s32 %v1128_v54, %v1269_v15  ;;  %v342_v46 = vadd.s32 %v1131_v55, %v1269_v15 }
  0x94   : > { %v230_v37 = vmul.u32 12, %v226_v38  ;;  %v231_v18 = vmul.u32 12, %v227_v39  ;;  %v343_v3 = vadd.s32 %v1134_v56, %v1269_v15  ;;  %v344_v48 = vadd.s32 %v1137_v57, %v1269_v15 }
  0x95   : > { %v232_v47 = vmul.u32 12, %v228_v40  ;;  %v233_v27 = vmul.u32 12, %v229_v41  ;;  %v377_v49 = vadd.s32 %v1140_v58, %v1219_v36  ;;  %v378_v38 = vadd.s32 %v1143_v59, %v1219_v36 }
  0x96   : > { %v234_v42 = vadd.s32 %v230_v37, %v187_v19  ;;  %v235_v16 = vadd.s32 %v231_v18, %v188_v2  ;;  %v379_v55 = vadd.s32 %v1146_v60, %v1219_v36  ;;  %v380_v56 = vadd.s32 %v1149_v61, %v1219_v36 }
  0x97   : > { %v236_v54 = vadd.s32 %v232_v47, %v189_v20  ;;  %v237_v39 = vadd.s32 %v233_v27, %v190_v21  ;;  %v381_v57 = vmul.u32 18, %v377_v49  ;;  %v382_v19 = vmul.u32 18, %v378_v38 }
  0x98   : > { %v281_v40 = vadd.s32 %v277_v24, %v234_v42  ;;  %v282_v41 = vadd.s32 %v278_v6, %v235_v16  ;;  %v383_v37 = vmul.u32 18, %v379_v55  ;;  %v384_v58 = vmul.u32 18, %v380_v56 }
  0x99   : > { %v283_v18 = vadd.s32 %v279_v9, %v236_v54  ;;  %v284_v2 = vadd.s32 %v280_v10, %v237_v39  ;;  %v385_v47 = vadd.s32 %v381_v57, %v341_v4  ;;  %v386_v61 = vadd.s32 %v382_v19, %v342_v46 }
  0x9a   : > { %vm285_vm0 = vcmp.ge.s32.totalorder %v281_v40, 1728  ;;  %vm286_vm1 = vcmp.ge.s32.totalorder %v282_v41, 1728  ;;  %v864_v59 = vadd.s32 4294965568, %v281_v40  ;;  %v865_v26 = vadd.s32 4294965568, %v282_v41 }
  0x9b   : > { %vm287_vm2 = vcmp.ge.s32.totalorder %v283_v18, 1728  ;;  %vm288_vm3 = vcmp.ge.s32.totalorder %v284_v2, 1728  ;;  %v866_v27 = vadd.s32 4294965568, %v283_v18  ;;  %v867_v20 = vadd.s32 4294965568, %v284_v2 }
  0x9c   : > { %v293_v60 = vsel %vm285_vm0, %v864_v59, %v281_v40  ;;  %v294_v21 = vsel %vm286_vm1, %v865_v26, %v282_v41  ;;  %v387_v9 = vadd.s32 %v383_v37, %v343_v3  ;;  %v388_v10 = vadd.s32 %v384_v58, %v344_v48 }
  0x9d   : > { %v295_v24 = vsel %vm287_vm2, %v866_v27, %v283_v18  ;;  %v296_v6 = vsel %vm288_vm3, %v867_v20, %v284_v2  ;;  %297 = vst [vmem:[%s1320_s27] sm:$0xff] %v293_v60  ;;  %298 = vst [vmem:[%s1320_s27 + $0x8] sm:$0xff] %v294_v21  ;;  %v429_v16 = vadd.s32 %v425_v12, %v385_v47  ;;  %v1430_v46 = vmul.u32 324, %v1244_v23 }
  0x9e   : > { %299 = vst [vmem:[%s1320_s27 + $0x10] sm:$0xff] %v295_v24  ;;  %300 = vst [vmem:[%s1320_s27 + $0x18] sm:$0xff] %v296_v6  ;;  %v430_v26 = vadd.s32 %v426_v13, %v386_v61  ;;  %v493_v42 = vadd.s32 %v1184_v28, %v1269_v15  ;;  %v494_v4 = vadd.s32 %v1187_v29, %v1269_v15  ;;  %v1431_v3 = vmul.u32 324, %v1247_v43 }
  0x9f   : > { %v431_v49 = vadd.s32 %v1430_v46, %v387_v9  ;;  %v495_v38 = vadd.s32 %v1190_v44, %v1269_v15  ;;  %v496_v5 = vadd.s32 %v1193_v30, %v1269_v15  ;;  %vm433_vm4 = vcmp.ge.s32.totalorder %v429_v16, 5832 }
  0xa0   : > { %v432_v48 = vadd.s32 %v1431_v3, %v388_v10  ;;  %vm434_vm5 = vcmp.ge.s32.totalorder %v430_v26, 5832  ;;  %v868_v22 = vadd.s32 4294961464, %v429_v16  ;;  %v869_v12 = vadd.s32 4294961464, %v430_v26 }
  0xa1   : > { %vm435_vm6 = vcmp.ge.s32.totalorder %v431_v49, 5832  ;;  %v870_v28 = vadd.s32 4294961464, %v431_v49  ;;  %v529_v43 = vadd.s32 %v1196_v52, %v1219_v36  ;;  %v530_v44 = vadd.s32 %v1199_v31, %v1219_v36 }
  0xa2   : > { %vm436_vm7 = vcmp.ge.s32.totalorder %v432_v48, 5832  ;;  %v871_v29 = vadd.s32 4294961464, %v432_v48  ;;  %v441_v23 = vsel %vm433_vm4, %v868_v22, %v429_v16  ;;  %v442_v13 = vsel %vm434_vm5, %v869_v12, %v430_v26 }
  0xa3   : > { %v443_v30 = vsel %vm435_vm6, %v870_v28, %v431_v49  ;;  %v445_v39 = vadd.s32 1728, %v441_v23  ;;  %v446_v55 = vadd.s32 1728, %v442_v13  ;;  %v531_v41 = vadd.s32 %v1202_v45, %v1219_v36 }
  0xa4   : > { %v444_v54 = vsel %vm436_vm7, %v871_v29, %v432_v48  ;;  %v447_v56 = vadd.s32 1728, %v443_v30  ;;  %v532_v57 = vadd.s32 %v1205_v53, %v1219_v36  ;;  %v533_v52 = vmul.u32 27, %v529_v43 }
  0xa5   : > { %v448_v40 = vadd.s32 1728, %v444_v54  ;;  %449 = vst [vmem:[%s1320_s27 + $0x20] sm:$0xff] %v445_v39  ;;  %450 = vst [vmem:[%s1320_s27 + $0x28] sm:$0xff] %v446_v55  ;;  %v534_v19 = vmul.u32 27, %v530_v44  ;;  %v645_v31 = vadd.s32 %v1208_v32, %v1269_v15  ;;  %v646_v18 = vadd.s32 %v1211_v33, %v1269_v15 }
  0xa6   : > { %451 = vst [vmem:[%s1320_s27 + $0x30] sm:$0xff] %v447_v56  ;;  %v535_v2 = vmul.u32 27, %v531_v41  ;;  %v536_v37 = vmul.u32 27, %v532_v57  ;;  %v647_v45 = vadd.s32 %v1214_v34, %v1269_v15  ;;  %v648_v53 = vadd.s32 %v1217_v35, %v1269_v15  ;;  %v777_v57 = vld [vmem:[%s1320_s27 + $0x18] sm:$0xff] (%p996_p4) }
  0xa7   : > { %452 = vst [vmem:[%s1320_s27 + $0x38] sm:$0xff] %v448_v40  ;;  %v537_v58 = vadd.s32 %v533_v52, %v493_v42  ;;  %v538_v59 = vadd.s32 %v534_v19, %v494_v4  ;;  %v681_v27 = vadd.s32 %v1222_v62, %v1219_v36  ;;  %v682_v32 = vadd.s32 %v1225_v63, %v1219_v36 }
  0xa8   : > { %v539_v20 = vadd.s32 %v535_v2, %v495_v38  ;;  %v540_v33 = vadd.s32 %v536_v37, %v496_v5  ;;  %v683_v60 = vadd.s32 %v1228_v0, %v1219_v36  ;;  %v684_v21 = vadd.s32 %v1231_v1, %v1219_v36  ;;  %778 = vst [vmem:[%s758_s3 + $0x18] sm:$0xff] (%p996_p4), %v777_v57 }
  0xa9   : > { %v1432_v34 = vmul.u32 729, %v1250_v7  ;;  %v1433_v35 = vmul.u32 729, %v1253_v8 }
  0xaa   : > { %v685_v61 = vmul.u32 2654435761, %v681_v27  ;;  %v686_v24 = vmul.u32 2654435761, %v682_v32 }
  0xab   : > { %v581_v47 = vadd.s32 %v1432_v34, %v537_v58  ;;  %v582_v15 = vadd.s32 %v1433_v35, %v538_v59  ;;  %v1434_v62 = vmul.u32 729, %v1256_v25  ;;  %v1435_v63 = vmul.u32 729, %v1259_v11 }
  0xac   : > { %v687_v10 = vmul.u32 2654435761, %v683_v60  ;;  %v688_v16 = vmul.u32 2654435761, %v684_v21  ;;  %v689_v25 = vxor.u32 %v685_v61, %v645_v31  ;;  %v690_v42 = vxor.u32 %v686_v24, %v646_v18  ;;  %v779_v52 = vld [vmem:[%s1320_s27 + $0x20] sm:$0xff] (%p996_p4)  ;;  %v781_v19 = vld [vmem:[%s1320_s27 + $0x28] sm:$0xff] (%p996_p4) }
  0xad   : > { %v583_v6 = vadd.s32 %v1434_v62, %v539_v20  ;;  %v584_v9 = vadd.s32 %v1435_v63, %v540_v33  ;;  %vm585_vm8 = vcmp.ge.s32.totalorder %v581_v47, 19688  ;;  %vm586_vm9 = vcmp.ge.s32.totalorder %v582_v15, 19688  ;;  %780 = vst [vmem:[%s758_s3 + $0x40] sm:$0xff] (%p996_p4), %v779_v52  ;;  %782 = vst [vmem:[%s758_s3 + $0x48] sm:$0xff] (%p996_p4), %v781_v19  ;;  %v783_v31 = vld [vmem:[%s1320_s27 + $0x30] sm:$0xff] (%p996_p4) }
  0xae   : > { %v872_v0 = vadd.s32 4294947608, %v581_v47  ;;  %v873_v36 = vadd.s32 4294947608, %v582_v15  ;;  %v691_v38 = vxor.u32 %v687_v10, %v647_v45  ;;  %v692_v5 = vxor.u32 %v688_v16, %v648_v53  ;;  %v785_v18 = vld [vmem:[%s1320_s27 + $0x38] sm:$0xff] (%p996_p4)  ;;  %784 = vst [vmem:[%s758_s3 + $0x50] sm:$0xff] (%p996_p4), %v783_v31 }
  0xaf   : > { %vm587_vm10 = vcmp.ge.s32.totalorder %v583_v6, 19688  ;;  %vm588_vm11 = vcmp.ge.s32.totalorder %v584_v9, 19688  ;;  %v874_v1 = vadd.s32 4294947608, %v583_v6  ;;  %v875_v7 = vadd.s32 4294947608, %v584_v9  ;;  %786 = vst [vmem:[%s758_s3 + $0x58] sm:$0xff] (%p996_p4), %v785_v18 }
  0xb0   : > { %v593_v8 = vsel %vm585_vm8, %v872_v0, %v581_v47  ;;  %v594_v26 = vsel %vm586_vm9, %v873_v36, %v582_v15  ;;  %v1436_v22 = vmul.u32 805459861, %v1264_v50  ;;  %v1437_v28 = vmul.u32 805459861, %v1267_v14  ;;  %v771_v14 = vld [vmem:[%s1320_s27] sm:$0xff] (%p996_p4) }
  0xb1   : > { %v595_v11 = vsel %vm587_vm10, %v874_v1, %v583_v6  ;;  %v596_v4 = vsel %vm588_vm11, %v875_v7, %v584_v9  ;;  %v597_v46 = vadd.s32 7560, %v593_v8  ;;  %v598_v49 = vadd.s32 7560, %v594_v26  ;;  %772 = vst [vmem:[%s758_s3] sm:$0xff] (%p996_p4), %v771_v14 }
  0xb2   : > { %v599_v3 = vadd.s32 7560, %v595_v11  ;;  %v600_v48 = vadd.s32 7560, %v596_v4  ;;  %v733_v12 = vxor.u32 %v1436_v22, %v689_v25  ;;  %v734_v29 = vxor.u32 %v1437_v28, %v690_v42 }
  0xb3   : > { %601 = vst [vmem:[%s1320_s27 + $0x40] sm:$0xff] %v597_v46  ;;  %602 = vst [vmem:[%s1320_s27 + $0x48] sm:$0xff] %v598_v49  ;;  %v1438_v23 = vmul.u32 805459861, %v1274_v51  ;;  %v1439_v43 = vmul.u32 805459861, %v1277_v17 }
  0xb4   : > { %603 = vst [vmem:[%s1320_s27 + $0x50] sm:$0xff] %v599_v3  ;;  %604 = vst [vmem:[%s1320_s27 + $0x58] sm:$0xff] %v600_v48  ;;  %v737_v30 = vand.u32 32767, %v733_v12  ;;  %v738_v54 = vand.u32 32767, %v734_v29  ;;  %v773_v51 = vld [vmem:[%s1320_s27 + $0x8] sm:$0xff] (%p996_p4)  ;;  %v775_v17 = vld [vmem:[%s1320_s27 + $0x10] sm:$0xff] (%p996_p4) }
  0xb5   : > { %v735_v13 = vxor.u32 %v1438_v23, %v691_v38  ;;  %v736_v44 = vxor.u32 %v1439_v43, %v692_v5  ;;  %755 = sbr.rel (!%p996_p4) target bundleno = 196 (0xc4), region = 32  ;;  %774 = vst [vmem:[%s758_s3 + $0x8] sm:$0xff] (%p996_p4), %v773_v51  ;;  %776 = vst [vmem:[%s758_s3 + $0x10] sm:$0xff] (%p996_p4), %v775_v17 }
  0xb6   : > { %v741_v50 = vadd.s32 27248, %v737_v30  ;;  %v742_v56 = vadd.s32 27248, %v738_v54 }
  0xb7   : > { %v739_v39 = vand.u32 32767, %v735_v13  ;;  %v740_v55 = vand.u32 32767, %v736_v44 }
  0xb8   : > { %745 = vst [vmem:[%s1320_s27 + $0x60] sm:$0xff] %v741_v50  ;;  %746 = vst [vmem:[%s1320_s27 + $0x68] sm:$0xff] %v742_v56 }
  0xb9   : > { %v743_v40 = vadd.s32 27248, %v739_v39  ;;  %v744_v41 = vadd.s32 27248, %v740_v55 }
  0xba   : > { %v787_v2 = vld [vmem:[%s1320_s27 + $0x40] sm:$0xff] (%p996_p4)  ;;  %v789_v37 = vld [vmem:[%s1320_s27 + $0x48] sm:$0xff] (%p996_p4) }
  0xbb   : > { %747 = vst [vmem:[%s1320_s27 + $0x70] sm:$0xff] %v743_v40  ;;  %748 = vst [vmem:[%s1320_s27 + $0x78] sm:$0xff] %v744_v41  ;;  %v791_v45 = vld [vmem:[%s1320_s27 + $0x50] sm:$0xff] (%p996_p4)  ;;  %v793_v53 = vld [vmem:[%s1320_s27 + $0x58] sm:$0xff] (%p996_p4) }
  0xbc   : > { %788 = vst [vmem:[%s758_s3 + $0x80] sm:$0xff] %v787_v2  ;;  %790 = vst [vmem:[%s758_s3 + $0x88] sm:$0xff] %v789_v37 }
  0xbd   : > { %792 = vst [vmem:[%s758_s3 + $0x90] sm:$0xff] %v791_v45  ;;  %794 = vst [vmem:[%s758_s3 + $0x98] sm:$0xff] %v793_v53 }
  0xbf   : > { %v795_v58 = vld [vmem:[%s1320_s27 + $0x60] sm:$0xff]  ;;  %v797_v59 = vld [vmem:[%s1320_s27 + $0x68] sm:$0xff] }
  0xc0   : > { %796 = vst [vmem:[%s758_s3 + $0xc0] sm:$0xff] %v795_v58  ;;  %798 = vst [vmem:[%s758_s3 + $0xc8] sm:$0xff] %v797_v59 }
  0xc2   : > { %v799_v27 = vld [vmem:[%s1320_s27 + $0x70] sm:$0xff]  ;;  %v801_v32 = vld [vmem:[%s1320_s27 + $0x78] sm:$0xff] }
  0xc3   : > { %800 = vst [vmem:[%s758_s3 + $0xd0] sm:$0xff] %v799_v27  ;;  %802 = vst [vmem:[%s758_s3 + $0xd8] sm:$0xff] %v801_v32 }
  0xc4 PF: > { %p9_p8 = scmp.ge.s32.totalorder %s986_s13, 4   ;;  %s1440_s9 = smov %s947_s10 }
  0xc5   : > { %s1441_s10 = smov %s994_s16  ;;  %s1442_s11 = smov %s986_s13 }
  0xc6   :  { %11 = sbr.rel (!%p9_p8) target bundleno = 2 (0x2), region = 81 }

// kernel: _lambda_.3
= control target key start
LH: loop header
LB: loop body
LE: loop exit
PB: predicated region body
PF: predicated region fallthrough
CT: control target
= control target key end

     0   :  { %s1970_s12 = smov 0   ;;  %s1972_s13 = smov 0   ;;  %s3055_s0 = inlined_call_operand.vmem [shape: s32[8,3], index: 0, kind: input, shape index: {}]   ;;  %s3056_s1 = inlined_call_operand.vmem [shape: f32[3,1024], index: 1, kind: input, shape index: {}]   ;;  %s3057_s2 = inlined_call_operand.vmem [shape: bf16[64,1024], index: 2, kind: input, shape index: {}]   ;;  %s3058_s3 = inlined_call_operand.vmem [shape: f32[8,1024], index: 3, kind: output, shape index: {}]  }
   0x1   :  { %s1974_s14 = smov 0  }
   0x2 LB: > { %s1867_s15 = sadd.s32 4294967295, %s1944_s14   ;;  %s1987_s16 = sadd.s32 1, %s1944_s14   ;;  %s1944_s14 = sphi %s1974_s14, %s3258_s14   ;;  %s1940_s13 = sphi %s1972_s13, %s3257_s13   ;;  %s1936_s12 = sphi %s1970_s12, %s3256_s12  }
   0x3   : > { %s64_s17 = ssub.s32 %s1944_s14, %s1987_s16  ;;  %s67_s18 = sadd.s32 1, %s1940_s13 }
   0x4   : > { %p65_p0 = scmp.eq.s32.totalorder %s64_s17, 0  ;;  %p74_p1 = scmp.ne.s32.totalorder %s1940_s13, %s1936_s12 }
   0x5   : > { %p75_p2 = scmp.eq.s32.totalorder %s1944_s14, 0  ;;  %p1870_p4 = scmp.ge.s32.totalorder %s1944_s14, 2 }
   0x6   : > { %s1996_s19 = scalar_select %p65_p0, %s1940_s13, %s67_s18  }
   0x7   : > { %p76_p3 = por %p75_p2, %p74_p1  ;;  %129 = sbr.rel (%p1870_p4) target bundleno = 26 (0x1a), region = 20 }
   0xe   : > { %141 = sbr.rel (!%p76_p3) target bundleno = 26 (0x1a), region = 28  ;;  %s143_s20 = sand.u32 (%p76_p3), 1, %s1940_s13  }
   0xf   : > { %s1889_s21 = sshll.u32 (%p76_p3), %s1944_s14, 4  ;;  %s1871_s22 = sshll.u32 (%p76_p3), %s143_s20, 7 }
  0x10   : > { %s2004_s25 = scalar_lea.vmem (%p76_p3), %s3057_s2, %s1889_s21  ;;  %s145_s26 = scalar_lea.vmem (%p76_p3), [#allocation2], %s1871_s22 }
  0x11   : > { %v161_v0 = vld [vmem:[%s2004_s25] sm:$0xff] (%p76_p3)  ;;  %v163_v1 = vld [vmem:[%s2004_s25 + $0x8] sm:$0xff] (%p76_p3) }
  0x12   : > { %v165_v2 = vld [vmem:[%s2004_s25 + $0x20] sm:$0xff] (%p76_p3)  ;;  %162 = vst [vmem:[%s145_s26] sm:$0xff] (%p76_p3), %v161_v0  ;;  %164 = vst [vmem:[%s145_s26 + $0x8] sm:$0xff] (%p76_p3), %v163_v1  ;;  %v167_v3 = vld [vmem:[%s2004_s25 + $0x28] sm:$0xff] (%p76_p3) }
  0x13   : > { %166 = vst [vmem:[%s145_s26 + $0x10] sm:$0xff] (%p76_p3), %v165_v2  ;;  %v169_v4 = vld [vmem:[%s2004_s25 + $0x40] sm:$0xff] (%p76_p3)  ;;  %v171_v5 = vld [vmem:[%s2004_s25 + $0x48] sm:$0xff] (%p76_p3)  ;;  %168 = vst [vmem:[%s145_s26 + $0x18] sm:$0xff] (%p76_p3), %v167_v3 }
  0x14   : > { %170 = vst [vmem:[%s145_s26 + $0x20] sm:$0xff] (%p76_p3), %v169_v4  ;;  %172 = vst [vmem:[%s145_s26 + $0x28] sm:$0xff] (%p76_p3), %v171_v5  ;;  %v173_v6 = vld [vmem:[%s2004_s25 + $0x60] sm:$0xff] (%p76_p3)  ;;  %v175_v7 = vld [vmem:[%s2004_s25 + $0x68] sm:$0xff] (%p76_p3) }
  0x15   : > { %v177_v8 = vld [vmem:[%s2004_s25 + $0x80] sm:$0xff]  ;;  %174 = vst [vmem:[%s145_s26 + $0x30] sm:$0xff] %v173_v6  ;;  %176 = vst [vmem:[%s145_s26 + $0x38] sm:$0xff] %v175_v7  ;;  %v179_v9 = vld [vmem:[%s2004_s25 + $0x88] sm:$0xff] }
  0x16   : > { %178 = vst [vmem:[%s145_s26 + $0x40] sm:$0xff] %v177_v8  ;;  %v181_v10 = vld [vmem:[%s2004_s25 + $0xa0] sm:$0xff]  ;;  %v183_v11 = vld [vmem:[%s2004_s25 + $0xa8] sm:$0xff]  ;;  %180 = vst [vmem:[%s145_s26 + $0x48] sm:$0xff] %v179_v9 }
  0x17   : > { %182 = vst [vmem:[%s145_s26 + $0x50] sm:$0xff] %v181_v10  ;;  %184 = vst [vmem:[%s145_s26 + $0x58] sm:$0xff] %v183_v11  ;;  %v185_v12 = vld [vmem:[%s2004_s25 + $0xc0] sm:$0xff]  ;;  %v187_v13 = vld [vmem:[%s2004_s25 + $0xc8] sm:$0xff] }
  0x18   : > { %v189_v14 = vld [vmem:[%s2004_s25 + $0xe0] sm:$0xff]  ;;  %186 = vst [vmem:[%s145_s26 + $0x60] sm:$0xff] %v185_v12  ;;  %188 = vst [vmem:[%s145_s26 + $0x68] sm:$0xff] %v187_v13  ;;  %v191_v15 = vld [vmem:[%s2004_s25 + $0xe8] sm:$0xff] }
  0x19   : > { %190 = vst [vmem:[%s145_s26 + $0x70] sm:$0xff] %v189_v14  ;;  %192 = vst [vmem:[%s145_s26 + $0x78] sm:$0xff] %v191_v15 }
  0x1a PF: > { %p1874_p5 = scmp.ge.s32.totalorder %s1944_s14, 1  ;;  %p197_p6 = scmp.lt.s32.totalorder %s1944_s14, 3 }
  0x1c   : > { %p198_p7 = pnand %p1874_p5, %p197_p6 }
  0x1e   : > { %201 = sbr.rel (%p198_p7) target bundleno = 276 (0x114), region = 51 }
  0x25   : > { %v245_v16 = vld [vmem:[%s3055_s0] sm:$0xff]  ;;  %v1946_v17 = vmov 0   ;;  %v1947_v18 = vmov 2   ;;  %v1948_v20 = vmov 1   ;;  %s1876_s29 = sshll.u32 %s1867_s15, 2  ;;  %s204_s7 = sand.u32 1, %s1936_s12   ;;  %v3059_v27 = vlaneseq }
  0x26   : > { %1918 = vset.pattern.permute.xlu0 %v1946_v17  ;;  %vm258_vm0 = vcmp.eq.s32.totalorder %v245_v16, 1  ;;  %1920 = vset.pattern.permute.xlu1 %v1947_v18  ;;  %p233_p8 = scmp.lt.s32.totalorder %s1876_s29, 7  ;;  %s1875_s8 = sshll.u32 %s204_s7, 7 }
  0x27   : > { %v259_v19 = vsel %vm258_vm0, 1, %v1946_v17  ;;  %v2043_v30 = vshrl.u32 %v3059_v27, 7  ;;  %s2057_s9 = scalar_lea.vmem [#allocation2], %s1875_s8 }
  0x28   : > { %261 = vperm.xlu0 %1918, %v259_v19   ;;  %429 = vperm.xlu1 %1920, %v259_v19   ;;  %s3260_s29 = smov (!%p233_p8, %s1876_s29), 7  ;;  %v2060_v37 = vld [vmem:[%s2057_s9] sm:$0xff]  ;;  %v2075_v42 = vld [vmem:[%s2057_s9 + $0x8] sm:$0xff] }
  0x29   : > { %s1877_s30 = sshll.u32 %s3260_s29, 2  ;;  %v2052_v35 = vsub.s32 0, %v2043_v30  ;;  %v2055_v36 = vsub.s32 4, %v2043_v30  ;;  %3091 = vst [vmem:[#allocation3_spill] sm:$0xff] %v2060_v37  ;;  %v2063_v38 = vsub.s32 1, %v2043_v30  ;;  %v2066_v39 = vsub.s32 5, %v2043_v30 }
  0x2a   : > { %s236_s6 = scalar_lea.vmem %s3056_s1, %s1877_s30  ;;  %v2069_v40 = vsub.s32 2, %v2043_v30  ;;  %v2072_v41 = vsub.s32 6, %v2043_v30  ;;  %3092 = vst [vmem:[#allocation4_spill] sm:$0xff] %v2075_v42  ;;  %v2078_v43 = vld [vmem:[%s2057_s9 + $0x40] sm:$0xff]  ;;  %v2090_v51 = vld [vmem:[%s2057_s9 + $0x48] sm:$0xff]  ;;  %s1879_s10 = sshll.u32 %s3260_s29, 3 }
  0x2b   : > { %v2035_v21 = vld [vmem:[%s236_s6] sm:$0x77]  ;;  %v2037_v22 = vld [vmem:[%s236_s6 + $0x8] sm:$0x77]  ;;  %3093 = vst [vmem:[#allocation5_spill] sm:$0xff] %v2078_v43  ;;  %3094 = vst [vmem:[#allocation6_spill] sm:$0xff] %v2090_v51  ;;  %s2868_s14 = scalar_lea.vmem %s3058_s3, %s1879_s10 }
  0x2c   : > { %1919 = vset.pattern.permute.xlu0 %v1948_v20  ;;  %v248_v23 = vmul.f32 11.0, %v2035_v21  ;;  %v249_v24 = vmul.f32 11.0, %v2037_v22  ;;  %v647_v32 = vmul.f32 17.0, %v2035_v21  ;;  %v648_v33 = vmul.f32 17.0, %v2037_v22 }
  0x2d   : > { %345 = vperm.xlu0 %1919, %v259_v19   ;;  %v1029_v47 = vmul.f32 26.0, %v2035_v21  ;;  %v1030_v52 = vmul.f32 26.0, %v2037_v22 }
  0x2e   : > { %v250_v25 = vadd.f32 0.5, %v248_v23  ;;  %v251_v26 = vadd.f32 0.5, %v249_v24  ;;  %v649_v45 = vadd.f32 0.5, %v647_v32  ;;  %v650_v46 = vadd.f32 0.5, %v648_v33 }
  0x2f   : > { %v2119_v7 = vadd.f32 0.5, %v1029_v47  ;;  %v2121_v8 = vadd.f32 0.5, %v1030_v52 }
  0x30   : > { %v252_v28 = vfloor.f32 %v250_v25  ;;  %v253_v29 = vfloor.f32 %v251_v26  ;;  %v651_v3 = vfloor.f32 %v649_v45  ;;  %v652_v4 = vfloor.f32 %v650_v46 }
  0x31   : > { %1921 = vset.pattern.permute.xlu0 %v1947_v18 }
  0x32   : > { %v2045_v31 = vsub.f32 %v250_v25, %v252_v28  ;;  %v2049_v34 = vsub.f32 %v251_v26, %v253_v29  ;;  %v2159_v25 = vsub.f32 %v649_v45, %v651_v3  ;;  %v2169_v32 = vsub.f32 %v650_v46, %v652_v4 }
  0x34   : > { %v2081_v44 = vsub.f32 1.0, %v2045_v31  ;;  %v2085_v48 = vsub.f32 1.0, %v2049_v34  ;;  %v269_v57 = vrot.slane %v2045_v31, %v2052_v35  ;;  %v273_v58 = vrot.slane %v2045_v31, %v2055_v36 }
  0x35   : > { %v277_v59 = vrot.slane %v2049_v34, %v2052_v35  ;;  %v281_v60 = vrot.slane %v2049_v34, %v2055_v36  ;;  %v351_v5 = vrot.slane %v2045_v31, %v2063_v38  ;;  %v355_v6 = vrot.slane %v2045_v31, %v2066_v39 }
  0x36   : > { %v307_v61 = vrot.slane %v2081_v44, %v2052_v35  ;;  %v311_v62 = vrot.slane %v2081_v44, %v2055_v36  ;;  %v315_v1 = vrot.slane %v2085_v48, %v2052_v35  ;;  %v319_v2 = vrot.slane %v2085_v48, %v2055_v36 }
  0x37   : > { %v2124_v9 = vrot.slane %v269_v57, %v2052_v35  ;;  %v2127_v10 = vrot.slane %v273_v58, %v2052_v35  ;;  %v2130_v11 = vrot.slane %v277_v59, %v2052_v35  ;;  %v2133_v12 = vrot.slane %v281_v60, %v2052_v35 }
  0x38   : > { %v2136_v13 = vrot.slane %v307_v61, %v2052_v35  ;;  %v2139_v14 = vrot.slane %v311_v62, %v2052_v35  ;;  %v359_v15 = vrot.slane %v2049_v34, %v2063_v38  ;;  %v363_v16 = vrot.slane %v2049_v34, %v2066_v39 }
  0x39   : > { %v2146_v17 = vrot.slane %v315_v1, %v2052_v35  ;;  %v2149_v18 = vrot.slane %v319_v2, %v2052_v35  ;;  %v387_v19 = vrot.slane %v2081_v44, %v2063_v38  ;;  %v391_v20 = vrot.slane %v2081_v44, %v2066_v39 }
  0x3a   : > { %v395_v23 = vrot.slane %v2085_v48, %v2063_v38  ;;  %v399_v24 = vrot.slane %v2085_v48, %v2066_v39  ;;  %v2162_v26 = vrot.slane %v351_v5, %v2063_v38  ;;  %v2165_v28 = vrot.slane %v355_v6, %v2063_v38 }
  0x3b   : > { %v435_v29 = vrot.slane %v2045_v31, %v2069_v40  ;;  %v2172_v33 = vrot.slane %v359_v15, %v2063_v38  ;;  %v2175_v47 = vrot.slane %v363_v16, %v2063_v38  ;;  %v439_v45 = vrot.slane %v2045_v31, %v2072_v41 }
  0x3c   : > { %3095 = vst [vmem:[#allocation7_spill] sm:$0xff] %v2162_v26  ;;  %3096 = vst [vmem:[#allocation8_spill] sm:$0xff] %v2165_v28  ;;  %v443_v52 = vrot.slane %v2049_v34, %v2069_v40  ;;  %v2182_v57 = vrot.slane %v387_v19, %v2063_v38  ;;  %v2185_v58 = vrot.slane %v391_v20, %v2063_v38  ;;  %v1949_v59 = vmov 1966171168  }
  0x3d   : > { %3097 = vst [vmem:[#allocation9_spill] sm:$0xff] %v2172_v33  ;;  %3098 = vst [vmem:[#allocation10_spill] sm:$0xff] %v2175_v47  ;;  %v447_v46 = vrot.slane %v2049_v34, %v2072_v41  ;;  %v559_v60 = vunpack.c.l.s4 %v1949_v59  ;;  %v2190_v61 = vrot.slane %v395_v23, %v2063_v38  ;;  %v2193_v62 = vrot.slane %v399_v24, %v2063_v38 }
  0x3e   : > { %3099 = vst [vmem:[#allocation11_spill] sm:$0xff] %v2182_v57  ;;  %3100 = vst [vmem:[#allocation12_spill] sm:$0xff] %v2185_v58  ;;  %v471_v31 = vrot.slane %v2081_v44, %v2069_v40  ;;  %v2198_v1 = vsub.f32 1.0, %v2159_v25  ;;  %v2201_v2 = vrot.slane %v435_v29, %v2069_v40  ;;  %v475_v34 = vrot.slane %v2081_v44, %v2072_v41 }
  0x3f   : > { %3101 = vst [vmem:[#allocation13_spill] sm:$0xff] %v2190_v61  ;;  %3102 = vst [vmem:[#allocation14_spill] sm:$0xff] %v2193_v62  ;;  %v479_v3 = vrot.slane %v2085_v48, %v2069_v40  ;;  %v2208_v4 = vsub.f32 1.0, %v2169_v32  ;;  %v2211_v5 = vrot.slane %v439_v45, %v2069_v40  ;;  %v2214_v6 = vrot.slane %v443_v52, %v2069_v40 }
  0x40   : > { %v483_v15 = vrot.slane %v2085_v48, %v2072_v41  ;;  %v662_v16 = vrot.slane %v2159_v25, %v2052_v35  ;;  %v2221_v44 = vrot.slane %v447_v46, %v2069_v40  ;;  %v560_v19 = vunpack.c.0.s8 %v559_v60 }
  0x41   : > { %v666_v20 = vrot.slane %v2159_v25, %v2055_v36  ;;  %v670_v23 = vrot.slane %v2169_v32, %v2052_v35  ;;  %v2228_v24 = vrot.slane %v471_v31, %v2069_v40  ;;  %v674_v29 = vrot.slane %v2169_v32, %v2055_v36 }
  0x42   : > { %v700_v48 = vrot.slane %v2198_v1, %v2052_v35  ;;  %v704_v45 = vrot.slane %v2198_v1, %v2055_v36  ;;  %v2237_v52 = vrot.slane %v475_v34, %v2069_v40  ;;  %v2240_v46 = vrot.slane %v479_v3, %v2069_v40 }
  0x43   : > { %v708_v59 = vrot.slane %v2208_v4, %v2052_v35  ;;  %v712_v60 = vrot.slane %v2208_v4, %v2055_v36  ;;  %v2247_v31 = vrot.slane %v483_v15, %v2069_v40  ;;  %v2250_v27 = vrot.slane %v662_v16, %v2052_v35 }
  0x44   : > { %v740_v0 = vrot.slane %v2159_v25, %v2063_v38  ;;  %v744_v34 = vrot.slane %v2159_v25, %v2066_v39  ;;  %v2257_v3 = vsub.s32 %v560_v19, %v2043_v30  ;;  %v2260_v63 = vrot.slane %v666_v20, %v2052_v35 }
  0x45   : > { %v2263_v56 = vrot.slane %v670_v23, %v2052_v35  ;;  %v748_v15 = vrot.slane %v2169_v32, %v2063_v38  ;;  %v2268_v16 = vrot.slane %v674_v29, %v2052_v35  ;;  %v2271_v55 = vrot.slane %v700_v48, %v2052_v35 }
  0x46   : > { %3103 = vst [vmem:[#allocation15_spill] sm:$0xff] %v2257_v3  ;;  %v2274_v54 = vrot.slane %v704_v45, %v2052_v35  ;;  %v752_v30 = vrot.slane %v2169_v32, %v2066_v39  ;;  %v2279_v19 = vrot.slane %v708_v59, %v2052_v35  ;;  %v2282_v20 = vrot.slane %v712_v60, %v2052_v35 }
  0x47   : > { %v776_v23 = vrot.slane %v2198_v1, %v2063_v38  ;;  %v1033_v29 = vfloor.f32 %v2119_v7  ;;  %v2288_v48 = vrot.slane %v740_v0, %v2063_v38  ;;  %v2291_v45 = vrot.slane %v744_v34, %v2063_v38 }
  0x48   : > { %v780_v53 = vrot.slane %v2198_v1, %v2066_v39  ;;  %v1034_v59 = vfloor.f32 %v2121_v8  ;;  %v2297_v50 = vrot.slane %v748_v15, %v2063_v38  ;;  %v784_v60 = vrot.slane %v2208_v4, %v2063_v38 }
  0x49   : > { %3104 = vst [vmem:[#allocation16_spill] sm:$0xff] %v2288_v48  ;;  %3105 = vst [vmem:[#allocation17_spill] sm:$0xff] %v2291_v45  ;;  %v788_v49 = vrot.slane %v2208_v4, %v2066_v39  ;;  %v820_v0 = vrot.slane %v2159_v25, %v2069_v40  ;;  %v2306_v34 = vrot.slane %v752_v30, %v2063_v38 }
  0x4a   : > { %3106 = vst [vmem:[#allocation18_spill] sm:$0xff] %v2297_v50  ;;  %v824_v3 = vrot.slane %v2159_v25, %v2072_v41  ;;  %v828_v15 = vrot.slane %v2169_v32, %v2069_v40  ;;  %v832_v51 = vrot.slane %v2169_v32, %v2072_v41  ;;  %v856_v43 = vrot.slane %v2198_v1, %v2069_v40 }
  0x4b   : > { %3107 = vst [vmem:[#allocation19_spill] sm:$0xff] %v2306_v34  ;;  %v860_v42 = vrot.slane %v2198_v1, %v2072_v41  ;;  %v864_v30 = vrot.slane %v2208_v4, %v2069_v40  ;;  %v2321_v37 = vsub.f32 %v2119_v7, %v1033_v29  ;;  %v2324_v25 = vrot.slane %v776_v23, %v2063_v38  ;;  %v2344_v23 = vld [vmem:[%s2057_s9 + $0x10] sm:$0xff] }
  0x4c   : > { %v2327_v34 = vrot.slane %v780_v53, %v2063_v38  ;;  %v868_v32 = vrot.slane %v2208_v4, %v2072_v41  ;;  %v2332_v50 = vsub.f32 %v2121_v8, %v1034_v59  ;;  %v2335_v1 = vrot.slane %v784_v60, %v2063_v38  ;;  %3112 = vst [vmem:[#allocation24_spill] sm:$0xff] %v2344_v23 }
  0x4d   : > { %3108 = vst [vmem:[#allocation20_spill] sm:$0xff] %v2324_v25  ;;  %v2338_v45 = vrot.slane %v788_v49, %v2063_v38  ;;  %v2341_v7 = vrot.slane %v820_v0, %v2069_v40  ;;  %v1411_v53 = vmul.f32 39.5, %v2035_v21  ;;  %v2348_v29 = vrot.slane %v824_v3, %v2069_v40  ;;  %v2357_v49 = vld [vmem:[%s2057_s9 + $0x18] sm:$0xff] }
  0x4e   : > { %3109 = vst [vmem:[#allocation21_spill] sm:$0xff] %v2327_v34  ;;  %3110 = vst [vmem:[#allocation22_spill] sm:$0xff] %v2335_v1  ;;  %v2351_v8 = vrot.slane %v828_v15, %v2069_v40  ;;  %v2354_v4 = vrot.slane %v832_v51, %v2069_v40  ;;  %v1412_v59 = vmul.f32 39.5, %v2037_v22  ;;  %v2361_v60 = vrot.slane %v856_v43, %v2069_v40  ;;  %v2378_v22 = vld [vmem:[%s2057_s9 + $0x50] sm:$0xff]  ;;  %v2386_v1 = vld [vmem:[%s2057_s9 + $0x58] sm:$0xff] }
  0x4f   : > { %3111 = vst [vmem:[#allocation23_spill] sm:$0xff] %v2338_v45  ;;  %3113 = vst [vmem:[#allocation25_spill] sm:$0xff] %v2357_v49  ;;  %v2364_v0 = vrot.slane %v860_v42, %v2069_v40  ;;  %v2367_v21 = vrot.slane %v864_v30, %v2069_v40  ;;  %v2370_v3 = vsub.f32 1.0, %v2321_v37  ;;  %v2373_v15 = vrot.slane %v868_v32, %v2069_v40 }
  0x50   : > { %3114 = vst [vmem:[#allocation26_spill] sm:$0xff] %v2378_v22  ;;  %v2381_v43 = vsub.f32 1.0, %v2332_v50  ;;  %3115 = vst [vmem:[#allocation27_spill] sm:$0xff] %v2386_v1  ;;  %v1044_v34 = vrot.slane %v2321_v37, %v2052_v35  ;;  %v1413_v32 = vadd.f32 0.5, %v1411_v53  ;;  %v1048_v51 = vrot.slane %v2321_v37, %v2055_v36 }
  0x51   : > { %v1052_v45 = vrot.slane %v2332_v50, %v2052_v35  ;;  %v1056_v23 = vrot.slane %v2332_v50, %v2055_v36  ;;  %v1414_v48 = vadd.f32 0.5, %v1412_v59  ;;  %v1082_v49 = vrot.slane %v2370_v3, %v2052_v35 }
  0x52   : > { %v1086_v53 = vrot.slane %v2370_v3, %v2055_v36  ;;  %v1090_v62 = vrot.slane %v2381_v43, %v2052_v35  ;;  %v1094_v59 = vrot.slane %v2381_v43, %v2055_v36  ;;  %v2409_v42 = vrot.slane %v1044_v34, %v2052_v35 }
  0x53   : > { %v1122_v30 = vrot.slane %v2321_v37, %v2063_v38  ;;  %v1126_v22 = vrot.slane %v2321_v37, %v2066_v39  ;;  %v1415_v33 = vfloor.f32 %v1413_v32  ;;  %v2416_v25 = vrot.slane %v1048_v51, %v2052_v35 }
  0x54   : > { %v2419_v47 = vrot.slane %v1052_v45, %v2052_v35  ;;  %v2422_v1 = vrot.slane %v1056_v23, %v2052_v35  ;;  %v1416_v61 = vfloor.f32 %v1414_v48  ;;  %v2425_v34 = vrot.slane %v1082_v49, %v2052_v35 }
  0x55   : > { %3116 = vst [vmem:[#allocation28_spill] sm:$0xff] %v2416_v25  ;;  %v2428_v28 = vrot.slane %v1086_v53, %v2052_v35  ;;  %v1130_v58 = vrot.slane %v2332_v50, %v2063_v38  ;;  %v1134_v51 = vrot.slane %v2332_v50, %v2066_v39  ;;  %v2435_v26 = vrot.slane %v1090_v62, %v2052_v35 }
  0x56   : > { %3117 = vst [vmem:[#allocation29_spill] sm:$0xff] %v2419_v47  ;;  %3118 = vst [vmem:[#allocation30_spill] sm:$0xff] %v2422_v1  ;;  %v2438_v45 = vrot.slane %v1094_v59, %v2052_v35  ;;  %v1158_v23 = vrot.slane %v2370_v3, %v2063_v38  ;;  %v1162_v49 = vrot.slane %v2370_v3, %v2066_v39 }
  0x57   : > { %3119 = vst [vmem:[#allocation31_spill] sm:$0xff] %v2428_v28  ;;  %3120 = vst [vmem:[#allocation32_spill] sm:$0xff] %v2435_v26  ;;  %v1166_v53 = vrot.slane %v2381_v43, %v2063_v38  ;;  %v1170_v1 = vrot.slane %v2381_v43, %v2066_v39  ;;  %v1202_v62 = vrot.slane %v2321_v37, %v2069_v40 }
  0x58   : > { %3121 = vst [vmem:[#allocation33_spill] sm:$0xff] %v2438_v45  ;;  %v2450_v57 = vsub.f32 %v1413_v32, %v1415_v33  ;;  %v1206_v59 = vrot.slane %v2321_v37, %v2072_v41  ;;  %v1210_v45 = vrot.slane %v2332_v50, %v2069_v40  ;;  %v1214_v47 = vrot.slane %v2332_v50, %v2072_v41 }
  0x59   : > { %v2458_v26 = vsub.f32 %v1414_v48, %v1416_v61  ;;  %v2461_v25 = vrot.slane %v1122_v30, %v2063_v38  ;;  %v2464_v28 = vrot.slane %v1126_v22, %v2063_v38  ;;  %v2467_v33 = vrot.slane %v1130_v58, %v2063_v38  ;;  %v2483_v22 = vld [vmem:[%s2057_s9 + $0x20] sm:$0xff] }
  0x5a   : > { %v2470_v32 = vrot.slane %v1134_v51, %v2063_v38  ;;  %v2473_v37 = vrot.slane %v1158_v23, %v2063_v38  ;;  %v2476_v50 = vrot.slane %v1162_v49, %v2063_v38  ;;  %v1238_v61 = vrot.slane %v2370_v3, %v2069_v40  ;;  %3128 = vst [vmem:[#allocation40_spill] sm:$0xff] %v2483_v22 }
  0x5b   : > { %3122 = vst [vmem:[#allocation34_spill] sm:$0xff] %v2461_v25  ;;  %3123 = vst [vmem:[#allocation35_spill] sm:$0xff] %v2464_v28  ;;  %v1242_v48 = vrot.slane %v2370_v3, %v2072_v41  ;;  %v2486_v58 = vrot.slane %v1166_v53, %v2063_v38  ;;  %v2489_v30 = vrot.slane %v1170_v1, %v2063_v38  ;;  %v2495_v23 = vsub.f32 1.0, %v2450_v57 }
  0x5c   : > { %3124 = vst [vmem:[#allocation36_spill] sm:$0xff] %v2467_v33  ;;  %3125 = vst [vmem:[#allocation37_spill] sm:$0xff] %v2470_v32  ;;  %v2492_v51 = vrot.slane %v1202_v62, %v2069_v40  ;;  %v2498_v49 = vrot.slane %v1206_v59, %v2069_v40  ;;  %v2501_v3 = vrot.slane %v1210_v45, %v2069_v40  ;;  %v2507_v53 = vsub.f32 1.0, %v2458_v26 }
  0x5d   : > { %3126 = vst [vmem:[#allocation38_spill] sm:$0xff] %v2473_v37  ;;  %3127 = vst [vmem:[#allocation39_spill] sm:$0xff] %v2476_v50  ;;  %v2504_v32 = vrot.slane %v1214_v47, %v2069_v40  ;;  %v1246_v1 = vrot.slane %v2381_v43, %v2069_v40  ;;  %v1250_v62 = vrot.slane %v2381_v43, %v2072_v41 }
  0x5e   : > { %3129 = vst [vmem:[#allocation41_spill] sm:$0xff] %v2486_v58  ;;  %3130 = vst [vmem:[#allocation42_spill] sm:$0xff] %v2489_v30  ;;  %v2519_v45 = vrot.slane %v1238_v61, %v2069_v40  ;;  %v2522_v47 = vrot.slane %v1242_v48, %v2069_v40  ;;  %v1430_v43 = vrot.slane %v2450_v57, %v2055_v36  ;;  %v2532_v30 = vld [vmem:[%s2057_s9 + $0x68] sm:$0xff] }
  0x5f   : > { %3131 = vst [vmem:[#allocation43_spill] sm:$0xff] %v2492_v51  ;;  %3132 = vst [vmem:[#allocation44_spill] sm:$0xff] %v2498_v49  ;;  %v2514_v51 = vld [vmem:[%s2057_s9 + $0x28] sm:$0xff]  ;;  %v1434_v59 = vrot.slane %v2458_v26, %v2052_v35  ;;  %v1438_v61 = vrot.slane %v2458_v26, %v2055_v36  ;;  %v1464_v48 = vrot.slane %v2495_v23, %v2052_v35 }
  0x60   : > { %3133 = vst [vmem:[#allocation45_spill] sm:$0xff] %v2501_v3  ;;  %3134 = vst [vmem:[#allocation46_spill] sm:$0xff] %v2504_v32  ;;  %v2525_v32 = vld [vmem:[%s2057_s9 + $0x60] sm:$0xff]  ;;  %v1426_v3 = vrot.slane %v2450_v57, %v2052_v35  ;;  %v1468_v49 = vrot.slane %v2495_v23, %v2055_v36  ;;  %v1476_v33 = vrot.slane %v2507_v53, %v2055_v36 }
  0x61   : > { %3135 = vst [vmem:[#allocation47_spill] sm:$0xff] %v2514_v51  ;;  %3136 = vst [vmem:[#allocation48_spill] sm:$0xff] %v2519_v45  ;;  %v1472_v45 = vrot.slane %v2507_v53, %v2052_v35  ;;  %v2549_v58 = vrot.slane %v1246_v1, %v2069_v40  ;;  %v2552_v28 = vrot.slane %v1250_v62, %v2069_v40 }
  0x62   : > { %3137 = vst [vmem:[#allocation49_spill] sm:$0xff] %v2522_v47  ;;  %3138 = vst [vmem:[#allocation50_spill] sm:$0xff] %v2532_v30  ;;  %v2559_v51 = vrot.slane %v1426_v3, %v2052_v35  ;;  %v2562_v37 = vrot.slane %v1430_v43, %v2052_v35  ;;  %v2565_v36 = vrot.slane %v1434_v59, %v2052_v35 }
  0x63   : > { %v2568_v1 = vrot.slane %v1438_v61, %v2052_v35  ;;  %v2571_v62 = vrot.slane %v1464_v48, %v2052_v35  ;;  %v2574_v25 = vrot.slane %v1468_v49, %v2052_v35  ;;  %v2577_v47 = vrot.slane %v1472_v45, %v2052_v35 }
  0x64   : > { %3139 = vst [vmem:[#allocation51_spill] sm:$0xff] %v2562_v37  ;;  %3140 = vst [vmem:[#allocation52_spill] sm:$0xff] %v2565_v36  ;;  %v2580_v3 = vrot.slane %v1476_v33, %v2052_v35  ;;  %v1504_v43 = vrot.slane %v2450_v57, %v2063_v38  ;;  %v1508_v59 = vrot.slane %v2450_v57, %v2066_v39 }
  0x65   : > { %3141 = vst [vmem:[#allocation53_spill] sm:$0xff] %v2568_v1  ;;  %3142 = vst [vmem:[#allocation54_spill] sm:$0xff] %v2574_v25  ;;  %v1512_v61 = vrot.slane %v2458_v26, %v2063_v38  ;;  %v1516_v48 = vrot.slane %v2458_v26, %v2066_v39  ;;  %v1540_v49 = vrot.slane %v2495_v23, %v2063_v38 }
  0x66   : > { %3143 = vst [vmem:[#allocation55_spill] sm:$0xff] %v2577_v47  ;;  %3144 = vst [vmem:[#allocation56_spill] sm:$0xff] %v2580_v3  ;;  %v1544_v45 = vrot.slane %v2495_v23, %v2066_v39  ;;  %v1548_v35 = vrot.slane %v2507_v53, %v2063_v38  ;;  %v1552_v33 = vrot.slane %v2507_v53, %v2066_v39 }
  0x67   : > { %v1584_v22 = vrot.slane %v2450_v57, %v2069_v40  ;;  %v1588_v50 = vrot.slane %v2450_v57, %v2072_v41  ;;  %v1592_v1 = vrot.slane %v2458_v26, %v2069_v40  ;;  %v1596_v3 = vrot.slane %v2458_v26, %v2072_v41 }
  0x68   : > { %v1620_v36 = vrot.slane %v2495_v23, %v2069_v40  ;;  %v1624_v39 = vrot.slane %v2495_v23, %v2072_v41  ;;  %v2611_v47 = vrot.slane %v1504_v43, %v2063_v38  ;;  %v2614_v30 = vrot.slane %v1508_v59, %v2063_v38  ;;  %v2633_v59 = vld [vmem:[%s2057_s9 + $0x30] sm:$0xff] }
  0x69   : > { %v1628_v57 = vrot.slane %v2507_v53, %v2069_v40  ;;  %v1632_v26 = vrot.slane %v2507_v53, %v2072_v41  ;;  %v2621_v37 = vrot.slane %v1512_v61, %v2063_v38  ;;  %v2624_v25 = vrot.slane %v1516_v48, %v2063_v38  ;;  %3147 = vst [vmem:[#allocation59_spill] sm:$0xff] %v2633_v59  ;;  %v2648_v48 = vld [vmem:[%s2057_s9 + $0x38] sm:$0xff] }
  0x6a   : > { %3145 = vst [vmem:[#allocation57_spill] sm:$0xff] %v2614_v30  ;;  %v2627_v23 = vrot.slane %v1540_v49, %v2063_v38  ;;  %v2630_v43 = vrot.slane %v1544_v45, %v2063_v38  ;;  %v2636_v30 = vrot.slane %v1548_v35, %v2063_v38  ;;  %v2639_v41 = vrot.slane %v1552_v33, %v2063_v38  ;;  %v2651_v49 = vld [vmem:[%s2057_s9 + $0x70] sm:$0xff] }
  0x6b   : > { %3146 = vst [vmem:[#allocation58_spill] sm:$0xff] %v2624_v25  ;;  %v2642_v53 = vrot.slane %v1584_v22, %v2069_v40  ;;  %v2645_v61 = vrot.slane %v1588_v50, %v2069_v40  ;;  %3149 = vst [vmem:[#allocation61_spill] sm:$0xff] %v2648_v48  ;;  %v2654_v45 = vrot.slane %v1592_v1, %v2069_v40  ;;  %v2666_v22 = vld [vmem:[%s2057_s9 + $0x78] sm:$0xff] }
  0x6c   : > { %3150 = vst [vmem:[#allocation62_spill] sm:$0xff] %v2651_v49  ;;  %v2657_v25 = vrot.slane %v1596_v3, %v2069_v40  ;;  %v2660_v35 = vrot.slane %v1620_v36, %v2069_v40  ;;  %v2663_v38 = vrot.slane %v1624_v39, %v2069_v40  ;;  %3153 = vst [vmem:[#allocation65_spill] sm:$0xff] %v2666_v22  ;;  %v3179_v36 = vld [vmem:[#allocation4_spill] sm:$0xff] }
  0x6d   : > { %3148 = vst [vmem:[#allocation60_spill] sm:$0xff] %v2645_v61  ;;  %3151 = vst [vmem:[#allocation63_spill] sm:$0xff] %v2654_v45  ;;  %v2669_v50 = vrot.slane %v1628_v57, %v2069_v40  ;;  %v2672_v33 = vrot.slane %v1632_v26, %v2069_v40 }
  0x6e   : > { %3152 = vst [vmem:[#allocation64_spill] sm:$0xff] %v2657_v25 }
  0x6f   : > { %3154 = vst [vmem:[#allocation66_spill] sm:$0xff] %v2669_v50  ;;  %3155 = vst [vmem:[#allocation67_spill] sm:$0xff] %v2672_v33 }
  0xa7   : > { %v2676_v3 = vpop.permute.xlu0 %261  ;;  %v2678_v25 = vpop.permute.xlu1 %429 }
  0xa8   : > { %vm263_vm1 = vcmp.eq.s32.totalorder %v2676_v3, 1  ;;  %vm431_vm2 = vcmp.eq.s32.totalorder %v2678_v25, 1 }
  0xa9   : > { %v340_v45 = vsel %vm263_vm1, %v2124_v9, %v2136_v13  ;;  %v341_v39 = vsel %vm263_vm1, %v2127_v10, %v2139_v14  ;;  %v342_v57 = vsel %vm263_vm1, %v2130_v11, %v2146_v17  ;;  %v343_v26 = vsel %vm263_vm1, %v2133_v12, %v2149_v18 }
  0xaa   : > { %v504_v9 = vsel %vm431_vm2, %v2201_v2, %v2228_v24  ;;  %v505_v10 = vsel %vm431_vm2, %v2211_v5, %v2237_v52  ;;  %v506_v11 = vsel %vm431_vm2, %v2214_v6, %v2240_v46  ;;  %v507_v12 = vsel %vm431_vm2, %v2221_v44, %v2247_v31  ;;  %v3156_v5 = vld [vmem:[#allocation31_spill] sm:$0xff]  ;;  %v3157_v6 = vld [vmem:[#allocation28_spill] sm:$0xff]  ;;  %v3159_v52 = vld [vmem:[#allocation29_spill] sm:$0xff] }
  0xab   : > { %v733_v13 = vsel %vm263_vm1, %v2250_v27, %v2271_v55  ;;  %v734_v14 = vsel %vm263_vm1, %v2260_v63, %v2274_v54  ;;  %v735_v17 = vsel %vm263_vm1, %v2263_v56, %v2279_v19  ;;  %v736_v18 = vsel %vm263_vm1, %v2268_v16, %v2282_v20  ;;  %v3158_v24 = vld [vmem:[#allocation32_spill] sm:$0xff]  ;;  %v3160_v31 = vld [vmem:[#allocation11_spill] sm:$0xff] }
  0xac   : > { %v2736_v2 = vpop.permute.xlu0 %345  ;;  %v2742_v27 = vsel %vm431_vm2, %v2341_v7, %v2361_v60  ;;  %v2748_v54 = vsel %vm431_vm2, %v2348_v29, %v2364_v0  ;;  %v2754_v55 = vsel %vm431_vm2, %v2351_v8, %v2367_v21  ;;  %v2760_v56 = vsel %vm431_vm2, %v2354_v4, %v2373_v15  ;;  %v3161_v16 = vld [vmem:[#allocation7_spill] sm:$0xff]  ;;  %v3162_v20 = vld [vmem:[#allocation12_spill] sm:$0xff]  ;;  %v3164_v8 = vld [vmem:[#allocation13_spill] sm:$0xff] }
  0xad   : > { %vm347_vm3 = vcmp.eq.s32.totalorder %v2736_v2, 1  ;;  %v2767_v63 = vsel %vm263_vm1, %v2409_v42, %v2425_v34  ;;  %v2773_v44 = vsel %vm263_vm1, %v3157_v6, %v3156_v5  ;;  %v2779_v46 = vsel %vm263_vm1, %v3159_v52, %v3158_v24  ;;  %v3163_v7 = vld [vmem:[#allocation8_spill] sm:$0xff]  ;;  %v3165_v4 = vld [vmem:[#allocation9_spill] sm:$0xff]  ;;  %v3166_v0 = vld [vmem:[#allocation14_spill] sm:$0xff] }
  0xae   : > { %v420_v19 = vsel %vm347_vm3, %v3161_v16, %v3160_v31  ;;  %v421_v29 = vsel %vm347_vm3, %v3163_v7, %v3162_v20  ;;  %v422_v60 = vsel %vm347_vm3, %v3165_v4, %v3164_v8  ;;  %v3167_v21 = vld [vmem:[#allocation10_spill] sm:$0xff]  ;;  %v3168_v24 = vld [vmem:[#allocation20_spill] sm:$0xff]  ;;  %v3170_v16 = vld [vmem:[#allocation21_spill] sm:$0xff] }
  0xaf   : > { %v423_v15 = vsel %vm347_vm3, %v3167_v21, %v3166_v0  ;;  %v424_v42 = vmul.f32 %v420_v19, %v340_v45  ;;  %v425_v34 = vmul.f32 %v421_v29, %v341_v39  ;;  %v426_v5 = vmul.f32 %v422_v60, %v342_v57  ;;  %v3169_v52 = vld [vmem:[#allocation16_spill] sm:$0xff]  ;;  %v3171_v20 = vld [vmem:[#allocation17_spill] sm:$0xff]  ;;  %v3172_v8 = vld [vmem:[#allocation22_spill] sm:$0xff] }
  0xb0   : > { %v427_v6 = vmul.f32 %v423_v15, %v343_v26  ;;  %v809_v31 = vsel %vm347_vm3, %v3169_v52, %v3168_v24  ;;  %v810_v7 = vsel %vm347_vm3, %v3171_v20, %v3170_v16  ;;  %v3173_v4 = vld [vmem:[#allocation18_spill] sm:$0xff]  ;;  %v3174_v0 = vld [vmem:[#allocation23_spill] sm:$0xff]  ;;  %v3239_v2 = vld [vmem:[#allocation60_spill] sm:$0xff] }
  0xb1   : > { %v811_v40 = vsel %vm347_vm3, %v3173_v4, %v3172_v8  ;;  %v3175_v45 = vld [vmem:[#allocation19_spill] sm:$0xff]  ;;  %v508_v57 = vmul.f32 %v504_v9, %v424_v42  ;;  %v509_v26 = vmul.f32 %v505_v10, %v425_v34  ;;  %v510_v19 = vmul.f32 %v506_v11, %v426_v5 }
  0xb2   : > { %v812_v39 = vsel %vm347_vm3, %v3175_v45, %v3174_v0  ;;  %v511_v29 = vmul.f32 %v507_v12, %v427_v6  ;;  %v2813_v60 = vmul.f32 %v809_v31, %v733_v13  ;;  %v2815_v21 = vmul.f32 %v810_v7, %v734_v14  ;;  %v3176_v52 = vld [vmem:[#allocation3_spill] sm:$0xff]  ;;  %v3182_v12 = vld [vmem:[#allocation5_spill] sm:$0xff] }
  0xb3   : > { %v2817_v15 = vmul.f32 %v811_v40, %v735_v17  ;;  %v2819_v24 = vmul.f32 %v812_v39, %v736_v18  ;;  %v3177_v16 = vunpack.c.l.bf16 %v3176_v52  ;;  %v3178_v8 = vunpack.c.h.bf16 %v3176_v52  ;;  %v3185_v18 = vld [vmem:[#allocation6_spill] sm:$0xff] }
  0xb4   : > { %v3180_v0 = vunpack.c.l.bf16 %v3179_v36  ;;  %v3181_v10 = vunpack.c.h.bf16 %v3179_v36  ;;  %v3183_v13 = vunpack.c.l.bf16 %v3182_v12  ;;  %v3184_v40 = vunpack.c.h.bf16 %v3182_v12 }
  0xb5   : > { %v524_v20 = vmul.f32 %v3177_v16, %v508_v57  ;;  %v525_v4 = vmul.f32 %v3178_v8, %v509_v26  ;;  %v3186_v42 = vunpack.c.l.bf16 %v3185_v18  ;;  %v3187_v5 = vunpack.c.h.bf16 %v3185_v18 }
  0xb6   : > { %v526_v9 = vmul.f32 %v3180_v0, %v510_v19  ;;  %v527_v11 = vmul.f32 %v3181_v10, %v511_v29  ;;  %v587_v14 = vmul.f32 %v3183_v13, %v508_v57  ;;  %v588_v17 = vmul.f32 %v3184_v40, %v509_v26 }
  0xb7   : > { %v589_v34 = vmul.f32 %v3186_v42, %v510_v19  ;;  %v590_v6 = vmul.f32 %v3187_v5, %v511_v29  ;;  %v528_v31 = vrot.slane %v524_v20, 4  ;;  %v534_v7 = vrot.slane %v525_v4, 4 }
  0xb8   : > { %v540_v45 = vrot.slane %v526_v9, 4  ;;  %v546_v39 = vrot.slane %v527_v11, 4  ;;  %v591_v52 = vrot.slane %v587_v14, 4  ;;  %v597_v16 = vrot.slane %v588_v17, 4 }
  0xb9   : > { %v603_v36 = vrot.slane %v589_v34, 4  ;;  %v609_v8 = vrot.slane %v590_v6, 4  ;;  %v529_v0 = vadd.f32 %v528_v31, %v524_v20  ;;  %v535_v10 = vadd.f32 %v534_v7, %v525_v4 }
  0xba   : > { %v541_v57 = vadd.f32 %v540_v45, %v526_v9  ;;  %v547_v13 = vadd.f32 %v546_v39, %v527_v11  ;;  %v592_v12 = vadd.f32 %v591_v52, %v587_v14  ;;  %v598_v26 = vadd.f32 %v597_v16, %v588_v17 }
  0xbb   : > { %v604_v40 = vadd.f32 %v603_v36, %v589_v34  ;;  %v610_v61 = vadd.f32 %v609_v8, %v590_v6  ;;  %v530_v19 = vrot.slane %v529_v0, 2  ;;  %v536_v42 = vrot.slane %v535_v10, 2 }
  0xbc   : > { %v542_v18 = vrot.slane %v541_v57, 2  ;;  %v548_v29 = vrot.slane %v547_v13, 2  ;;  %v593_v5 = vrot.slane %v592_v12, 2  ;;  %v599_v1 = vrot.slane %v598_v26, 2 }
  0xbd   : > { %v605_v22 = vrot.slane %v604_v40, 2  ;;  %v611_v48 = vrot.slane %v610_v61, 2  ;;  %v531_v49 = vadd.f32 %v530_v19, %v529_v0  ;;  %v537_v59 = vadd.f32 %v536_v42, %v535_v10 }
  0xbe   : > { %v543_v33 = vadd.f32 %v542_v18, %v541_v57  ;;  %v549_v50 = vadd.f32 %v548_v29, %v547_v13  ;;  %v594_v20 = vadd.f32 %v593_v5, %v592_v12  ;;  %v600_v4 = vadd.f32 %v599_v1, %v598_v26  ;;  %v3192_v18 = vld [vmem:[#allocation24_spill] sm:$0xff] }
  0xbf   : > { %v606_v9 = vadd.f32 %v605_v22, %v604_v40  ;;  %v612_v11 = vadd.f32 %v611_v48, %v610_v61  ;;  %v532_v14 = vrot.slane %v531_v49, 1  ;;  %v538_v17 = vrot.slane %v537_v59, 1 }
  0xc0   : > { %v544_v34 = vrot.slane %v543_v33, 1  ;;  %v550_v6 = vrot.slane %v549_v50, 1  ;;  %v3188_v31 = vlaneseq  ;;  %v595_v45 = vrot.slane %v594_v20, 1 }
  0xc1   : > { %v601_v39 = vrot.slane %v600_v4, 1  ;;  %v607_v52 = vrot.slane %v606_v9, 1  ;;  %v613_v16 = vrot.slane %v612_v11, 1  ;;  %v533_v36 = vadd.f32 %v532_v14, %v531_v49  ;;  %v3198_v14 = vld [vmem:[#allocation26_spill] sm:$0xff] }
  0xc2   : > { %vm2838_vm4 = vcmp.lt.s32.totalorder %v3188_v31, 512  ;;  %v539_v8 = vadd.f32 %v538_v17, %v537_v59  ;;  %v545_v0 = vadd.f32 %v544_v34, %v543_v33  ;;  %v551_v1 = vadd.f32 %v550_v6, %v549_v50  ;;  %v3191_v50 = vld [vmem:[#allocation15_spill] sm:$0xff] }
  0xc3   : > { %v596_v22 = vadd.f32 %v595_v45, %v594_v20  ;;  %v602_v61 = vadd.f32 %v601_v39, %v600_v4  ;;  %v608_v48 = vadd.f32 %v607_v52, %v606_v9  ;;  %v614_v10 = vadd.f32 %v613_v16, %v612_v11  ;;  %v3195_v20 = vld [vmem:[#allocation25_spill] sm:$0xff] }
  0xc4   : > { %v556_v57 = vcombine.low %v533_v36, %v539_v8  ;;  %v557_v13 = vcombine.low %v545_v0, %v551_v1  ;;  %v893_v12 = vmul.f32 %v2742_v27, %v2813_v60  ;;  %v894_v26 = vmul.f32 %v2748_v54, %v2815_v21  ;;  %v3201_v0 = vld [vmem:[#allocation27_spill] sm:$0xff] }
  0xc5   : > { %v619_v40 = vcombine.low %v596_v22, %v602_v61  ;;  %v620_v19 = vcombine.low %v608_v48, %v614_v10  ;;  %v895_v49 = vmul.f32 %v2754_v55, %v2817_v15  ;;  %v896_v59 = vmul.f32 %v2760_v56, %v2819_v24 }
  0xc6   : > { %v564_v33 = vrot.slane %v556_v57, %v3191_v50  ;;  %v571_v42 = vrot.slane %v557_v13, %v3191_v50  ;;  %v3193_v29 = vunpack.c.l.bf16 %v3192_v18  ;;  %v3194_v27 = vunpack.c.h.bf16 %v3192_v18 }
  0xc7   : > { %v627_v54 = vrot.slane %v619_v40, %v3191_v50  ;;  %v634_v21 = vrot.slane %v620_v19, %v3191_v50  ;;  %v3196_v55 = vunpack.c.l.bf16 %v3195_v20  ;;  %v3197_v56 = vunpack.c.h.bf16 %v3195_v20 }
  0xc8   : > { %v909_v5 = vmul.f32 %v3193_v29, %v893_v12  ;;  %v910_v60 = vmul.f32 %v3194_v27, %v894_v26  ;;  %v572_v4 = vcombine.low %v564_v33, %v571_v42  ;;  %v3199_v17 = vunpack.c.l.bf16 %v3198_v14 }
  0xc9   : > { %v911_v15 = vmul.f32 %v3196_v55, %v895_v49  ;;  %v912_v24 = vmul.f32 %v3197_v56, %v896_v59  ;;  %v635_v6 = vcombine.low %v627_v54, %v634_v21  ;;  %v3200_v39 = vunpack.c.h.bf16 %v3198_v14 }
  0xca   : > { %v913_v9 = vrot.slane %v909_v5, 4  ;;  %v919_v11 = vrot.slane %v910_v60, 4  ;;  %v969_v34 = vmul.f32 %v3199_v17, %v893_v12  ;;  %v579_v16 = vrot.slane %v572_v4, %v3191_v50 }
  0xcb   : > { %v925_v31 = vrot.slane %v911_v15, 4  ;;  %v931_v45 = vrot.slane %v912_v24, 4  ;;  %v970_v52 = vmul.f32 %v3200_v39, %v894_v26  ;;  %v3202_v1 = vunpack.c.l.bf16 %v3201_v0 }
  0xcc   : > { %v914_v36 = vadd.f32 %v913_v9, %v909_v5  ;;  %v920_v8 = vadd.f32 %v919_v11, %v910_v60  ;;  %v642_v61 = vrot.slane %v635_v6, %v3191_v50  ;;  %v3203_v57 = vunpack.c.h.bf16 %v3201_v0  ;;  %585 = vst.msk [vmem:[%s2868_s14] ss:$8 sm:$0xf] %vm2838_vm4, %v579_v16 }
  0xcd   : > { %v971_v22 = vmul.f32 %v3202_v1, %v895_v49  ;;  %v926_v48 = vadd.f32 %v925_v31, %v911_v15  ;;  %v932_v10 = vadd.f32 %v931_v45, %v912_v24  ;;  %v973_v26 = vrot.slane %v969_v34, 4  ;;  %v3204_v1 = vld [vmem:[#allocation33_spill] sm:$0xff] }
  0xce   : > { %v972_v13 = vmul.f32 %v3203_v57, %v896_v59  ;;  %v915_v12 = vrot.slane %v914_v36, 2  ;;  %v921_v40 = vrot.slane %v920_v8, 2  ;;  %v979_v19 = vrot.slane %v970_v52, 4  ;;  %1880 = vst.msk [vmem:[%s2868_s14 + $0x1] ss:$8 sm:$0xf] %vm2838_vm4, %v642_v61 }
  0xcf   : > { %v927_v33 = vrot.slane %v926_v48, 2  ;;  %v933_v42 = vrot.slane %v932_v10, 2  ;;  %v985_v49 = vrot.slane %v971_v22, 4  ;;  %v974_v27 = vadd.f32 %v973_v26, %v969_v34 }
  0xd0   : > { %v991_v18 = vrot.slane %v972_v13, 4  ;;  %v916_v29 = vadd.f32 %v915_v12, %v914_v36  ;;  %v922_v5 = vadd.f32 %v921_v40, %v920_v8  ;;  %v980_v60 = vadd.f32 %v979_v19, %v970_v52  ;;  %v3207_v12 = vld [vmem:[#allocation34_spill] sm:$0xff] }
  0xd1   : > { %v928_v54 = vadd.f32 %v927_v33, %v926_v48  ;;  %v934_v59 = vadd.f32 %v933_v42, %v932_v10  ;;  %v986_v21 = vadd.f32 %v985_v49, %v971_v22  ;;  %v975_v56 = vrot.slane %v974_v27, 2  ;;  %v3205_v22 = vld [vmem:[#allocation30_spill] sm:$0xff]  ;;  %v3208_v42 = vld [vmem:[#allocation39_spill] sm:$0xff] }
  0xd2   : > { %v992_v20 = vadd.f32 %v991_v18, %v972_v13  ;;  %v917_v55 = vrot.slane %v916_v29, 1  ;;  %v923_v15 = vrot.slane %v922_v5, 1  ;;  %v981_v24 = vrot.slane %v980_v60, 2  ;;  %v3206_v13 = vld [vmem:[#allocation38_spill] sm:$0xff]  ;;  %v3209_v49 = vld [vmem:[#allocation35_spill] sm:$0xff] }
  0xd3   : > { %v929_v4 = vrot.slane %v928_v54, 1  ;;  %v935_v9 = vrot.slane %v934_v59, 1  ;;  %v987_v11 = vrot.slane %v986_v21, 2  ;;  %v976_v31 = vadd.f32 %v975_v56, %v974_v27 }
  0xd4   : > { %v993_v14 = vrot.slane %v992_v20, 2  ;;  %v918_v17 = vadd.f32 %v917_v55, %v916_v29  ;;  %v924_v6 = vadd.f32 %v923_v15, %v922_v5  ;;  %v982_v45 = vadd.f32 %v981_v24, %v980_v60  ;;  %v3210_v60 = vld [vmem:[#allocation41_spill] sm:$0xff] }
  0xd5   : > { %v930_v39 = vadd.f32 %v929_v4, %v928_v54  ;;  %v936_v16 = vadd.f32 %v935_v9, %v934_v59  ;;  %v988_v34 = vadd.f32 %v987_v11, %v986_v21  ;;  %v977_v8 = vrot.slane %v976_v31, 1  ;;  %v3211_v54 = vld [vmem:[#allocation36_spill] sm:$0xff]  ;;  %v3213_v55 = vld [vmem:[#allocation37_spill] sm:$0xff] }
  0xd6   : > { %v994_v52 = vadd.f32 %v993_v14, %v992_v20  ;;  %v941_v36 = vcombine.low %v918_v17, %v924_v6  ;;  %v983_v0 = vrot.slane %v982_v45, 1  ;;  %v1118_v61 = vsel %vm263_vm1, %v3205_v22, %v3204_v1  ;;  %v3212_v20 = vld [vmem:[#allocation42_spill] sm:$0xff]  ;;  %v3214_v6 = vld [vmem:[#allocation48_spill] sm:$0xff] }
  0xd7   : > { %v942_v48 = vcombine.low %v930_v39, %v936_v16  ;;  %v989_v10 = vrot.slane %v988_v34, 1  ;;  %v1191_v40 = vsel %vm347_vm3, %v3207_v12, %v3206_v13  ;;  %v978_v19 = vadd.f32 %v977_v8, %v976_v31  ;;  %v3215_v31 = vld [vmem:[#allocation43_spill] sm:$0xff]  ;;  %v3216_v39 = vld [vmem:[#allocation49_spill] sm:$0xff]  ;;  %v3217_v16 = vld [vmem:[#allocation44_spill] sm:$0xff] }
  0xd8   : > { %v995_v57 = vrot.slane %v994_v52, 1  ;;  %v949_v26 = vrot.slane %v941_v36, %v3191_v50  ;;  %v984_v33 = vadd.f32 %v983_v0, %v982_v45  ;;  %v1192_v18 = vsel %vm347_vm3, %v3209_v49, %v3208_v42  ;;  %v3219_v36 = vld [vmem:[#allocation46_spill] sm:$0xff] }
  0xd9   : > { %v956_v29 = vrot.slane %v942_v48, %v3191_v50  ;;  %v990_v5 = vadd.f32 %v989_v10, %v988_v34  ;;  %v1193_v59 = vsel %vm347_vm3, %v3211_v54, %v3210_v60  ;;  %v1194_v15 = vsel %vm347_vm3, %v3213_v55, %v3212_v20  ;;  %v3220_v10 = vld [vmem:[#allocation40_spill] sm:$0xff] }
  0xda   : > { %v996_v27 = vadd.f32 %v995_v57, %v994_v52  ;;  %v1001_v21 = vcombine.low %v978_v19, %v984_v33  ;;  %v1195_v56 = vmul.f32 %v1191_v40, %v2767_v63  ;;  %v1196_v24 = vmul.f32 %v1192_v18, %v2773_v44  ;;  %v3218_v44 = vld [vmem:[#allocation45_spill] sm:$0xff]  ;;  %v3223_v40 = vld [vmem:[#allocation54_spill] sm:$0xff]  ;;  %v3226_v33 = vld [vmem:[#allocation47_spill] sm:$0xff] }
  0xdb   : > { %v957_v4 = vcombine.low %v949_v26, %v956_v29  ;;  %v1197_v11 = vmul.f32 %v1193_v59, %v2779_v46  ;;  %v1198_v14 = vmul.f32 %v1194_v15, %v1118_v61  ;;  %v1271_v45 = vsel %vm431_vm2, %v3215_v31, %v3214_v6  ;;  %v3224_v26 = vld [vmem:[#allocation51_spill] sm:$0xff]  ;;  %v3230_v59 = vld [vmem:[#allocation50_spill] sm:$0xff] }
  0xdc   : > { %v1002_v9 = vcombine.low %v990_v5, %v996_v27  ;;  %v1009_v17 = vrot.slane %v1001_v21, %v3191_v50  ;;  %v1272_v63 = vsel %vm431_vm2, %v3217_v16, %v3216_v39  ;;  %v1273_v34 = vsel %vm431_vm2, %v3218_v44, %v2549_v58 }
  0xdd   : > { %v964_v46 = vrot.slane %v957_v4, %v3191_v50  ;;  %v1274_v8 = vsel %vm431_vm2, %v3219_v36, %v2552_v28  ;;  %v1275_v0 = vmul.f32 %v1271_v45, %v1195_v56  ;;  %v1276_v1 = vmul.f32 %v1272_v63, %v1196_v24 }
  0xde   : > { %v1016_v52 = vrot.slane %v1002_v9, %v3191_v50  ;;  %v1277_v22 = vmul.f32 %v1273_v34, %v1197_v11  ;;  %v1278_v61 = vmul.f32 %v1274_v8, %v1198_v14  ;;  %v2932_v48 = vsel %vm263_vm1, %v2559_v51, %v2571_v62 }
  0xdf   : > { %1881 = vst.msk [vmem:[%s2868_s14 + $0x2] ss:$8 sm:$0xf] %vm2838_vm4, %v964_v46  ;;  %v3221_v57 = vunpack.c.l.bf16 %v3220_v10  ;;  %v3222_v28 = vunpack.c.l.bf16 %v2525_v32  ;;  %v2945_v19 = vsel %vm263_vm1, %v3224_v26, %v3223_v40  ;;  %v3225_v51 = vunpack.c.h.bf16 %v3220_v10 }
  0xe0   : > { %v1017_v58 = vcombine.low %v1009_v17, %v1016_v52  ;;  %v3227_v42 = vunpack.c.l.bf16 %v3226_v33  ;;  %v3228_v18 = vunpack.c.h.bf16 %v3226_v33  ;;  %v3229_v5 = vunpack.c.h.bf16 %v2525_v32 }
  0xe1   : > { %v1291_v13 = vmul.f32 %v3221_v57, %v1275_v0  ;;  %v1351_v12 = vmul.f32 %v3222_v28, %v1275_v0  ;;  %v1292_v62 = vmul.f32 %v3225_v51, %v1276_v1  ;;  %v3231_v21 = vunpack.c.l.bf16 %v3230_v59 }
  0xe2   : > { %v1293_v49 = vmul.f32 %v3227_v42, %v1277_v22  ;;  %v1294_v29 = vmul.f32 %v3228_v18, %v1278_v61  ;;  %v1352_v27 = vmul.f32 %v3229_v5, %v1276_v1  ;;  %v1024_v60 = vrot.slane %v1017_v58, %v3191_v50 }
  0xe3   : > { %v1295_v54 = vrot.slane %v1291_v13, 4  ;;  %v1353_v20 = vmul.f32 %v3231_v21, %v1277_v22  ;;  %v3232_v55 = vunpack.c.h.bf16 %v3230_v59  ;;  %v1301_v56 = vrot.slane %v1292_v62, 4 }
  0xe4   : > { %v1307_v24 = vrot.slane %v1293_v49, 4  ;;  %v1313_v4 = vrot.slane %v1294_v29, 4  ;;  %v1355_v9 = vrot.slane %v1351_v12, 4  ;;  %1882 = vst.msk [vmem:[%s2868_s14 + $0x3] ss:$8 sm:$0xf] %vm2838_vm4, %v1024_v60 }
  0xe5   : > { %v1354_v15 = vmul.f32 %v3232_v55, %v1278_v61  ;;  %v1296_v11 = vadd.f32 %v1295_v54, %v1291_v13  ;;  %v1361_v14 = vrot.slane %v1352_v27, 4  ;;  %v1367_v32 = vrot.slane %v1353_v20, 4 }
  0xe6   : > { %v1302_v6 = vadd.f32 %v1301_v56, %v1292_v62  ;;  %v1308_v31 = vadd.f32 %v1307_v24, %v1293_v49  ;;  %v1314_v45 = vadd.f32 %v1313_v4, %v1294_v29  ;;  %v1356_v39 = vadd.f32 %v1355_v9, %v1351_v12  ;;  %v3234_v56 = vld [vmem:[#allocation52_spill] sm:$0xff] }
  0xe7   : > { %v1373_v17 = vrot.slane %v1354_v15, 4  ;;  %v1297_v16 = vrot.slane %v1296_v11, 2  ;;  %v1362_v63 = vadd.f32 %v1361_v14, %v1352_v27  ;;  %v1368_v44 = vadd.f32 %v1367_v32, %v1353_v20  ;;  %v3236_v14 = vld [vmem:[#allocation53_spill] sm:$0xff] }
  0xe8   : > { %v1303_v46 = vrot.slane %v1302_v6, 2  ;;  %v1309_v52 = vrot.slane %v1308_v31, 2  ;;  %v1315_v36 = vrot.slane %v1314_v45, 2  ;;  %v1357_v8 = vrot.slane %v1356_v39, 2 }
  0xe9   : > { %v1374_v34 = vadd.f32 %v1373_v17, %v1354_v15  ;;  %v1298_v0 = vadd.f32 %v1297_v16, %v1296_v11  ;;  %v1363_v1 = vrot.slane %v1362_v63, 2  ;;  %v1369_v22 = vrot.slane %v1368_v44, 2  ;;  %v3233_v15 = vld [vmem:[#allocation55_spill] sm:$0xff]  ;;  %v3235_v11 = vld [vmem:[#allocation56_spill] sm:$0xff] }
  0xea   : > { %v1304_v58 = vadd.f32 %v1303_v46, %v1302_v6  ;;  %v1310_v10 = vadd.f32 %v1309_v52, %v1308_v31  ;;  %v1316_v57 = vadd.f32 %v1315_v36, %v1314_v45  ;;  %v1358_v13 = vadd.f32 %v1357_v8, %v1356_v39  ;;  %v3237_v45 = vld [vmem:[#allocation57_spill] sm:$0xff]  ;;  %v3240_v8 = vld [vmem:[#allocation66_spill] sm:$0xff] }
  0xeb   : > { %v1375_v61 = vrot.slane %v1374_v34, 2  ;;  %v1299_v28 = vrot.slane %v1298_v0, 1  ;;  %v1364_v40 = vadd.f32 %v1363_v1, %v1362_v63  ;;  %v1370_v26 = vadd.f32 %v1369_v22, %v1368_v44  ;;  %v3238_v44 = vld [vmem:[#allocation58_spill] sm:$0xff]  ;;  %v3242_v1 = vld [vmem:[#allocation67_spill] sm:$0xff]  ;;  %v3243_v22 = vld [vmem:[#allocation64_spill] sm:$0xff] }
  0xec   : > { %v1305_v51 = vrot.slane %v1304_v58, 1  ;;  %v1311_v62 = vrot.slane %v1310_v10, 1  ;;  %v1317_v33 = vrot.slane %v1316_v57, 1  ;;  %v1359_v42 = vrot.slane %v1358_v13, 1 }
  0xed   : > { %v1376_v12 = vadd.f32 %v1375_v61, %v1374_v34  ;;  %v1300_v49 = vadd.f32 %v1299_v28, %v1298_v0  ;;  %v1365_v18 = vrot.slane %v1364_v40, 1  ;;  %v1371_v29 = vrot.slane %v1370_v26, 1  ;;  %v3241_v0 = vld [vmem:[#allocation63_spill] sm:$0xff] }
  0xee   : > { %v1306_v27 = vadd.f32 %v1305_v51, %v1304_v58  ;;  %v1312_v60 = vadd.f32 %v1311_v62, %v1310_v10  ;;  %v1318_v54 = vadd.f32 %v1317_v33, %v1316_v57  ;;  %v1360_v59 = vadd.f32 %v1359_v42, %v1358_v13  ;;  %v3244_v13 = vld [vmem:[#allocation59_spill] sm:$0xff]  ;;  %v3249_v33 = vld [vmem:[#allocation61_spill] sm:$0xff] }
  0xef   : > { %v1377_v5 = vrot.slane %v1376_v12, 1  ;;  %v1366_v21 = vadd.f32 %v1365_v18, %v1364_v40  ;;  %v1372_v20 = vadd.f32 %v1371_v29, %v1370_v26  ;;  %v1499_v24 = vsel %vm263_vm1, %v3234_v56, %v3233_v15  ;;  %v3246_v26 = vld [vmem:[#allocation62_spill] sm:$0xff] }
  0xf0   : > { %v1323_v4 = vcombine.low %v1300_v49, %v1306_v27  ;;  %v1324_v9 = vcombine.low %v1312_v60, %v1318_v54  ;;  %v1500_v32 = vsel %vm263_vm1, %v3236_v14, %v3235_v11  ;;  %v1573_v17 = vsel %vm347_vm3, %v2611_v47, %v2627_v23  ;;  %v3253_v54 = vld [vmem:[#allocation65_spill] sm:$0xff] }
  0xf1   : > { %v1378_v55 = vadd.f32 %v1377_v5, %v1376_v12  ;;  %v1383_v6 = vcombine.low %v1360_v59, %v1366_v21  ;;  %v1574_v39 = vsel %vm347_vm3, %v3237_v45, %v2630_v43  ;;  %v1575_v16 = vsel %vm347_vm3, %v2621_v37, %v2636_v30 }
  0xf2   : > { %v1331_v3 = vrot.slane %v1323_v4, %v3191_v50  ;;  %v1338_v63 = vrot.slane %v1324_v9, %v3191_v50  ;;  %v1576_v47 = vsel %vm347_vm3, %v3238_v44, %v2639_v41  ;;  %v1577_v23 = vmul.f32 %v1573_v17, %v2932_v48 }
  0xf3   : > { %v1384_v31 = vcombine.low %v1372_v20, %v1378_v55  ;;  %v1391_v34 = vrot.slane %v1383_v6, %v3191_v50  ;;  %v1578_v46 = vmul.f32 %v1574_v39, %v2945_v19  ;;  %v1579_v52 = vmul.f32 %v1575_v16, %v1499_v24 }
  0xf4   : > { %v1339_v37 = vcombine.low %v1331_v3, %v1338_v63  ;;  %v1580_v30 = vmul.f32 %v1576_v47, %v1500_v32  ;;  %v1653_v36 = vsel %vm431_vm2, %v2642_v53, %v2660_v35  ;;  %v1654_v41 = vsel %vm431_vm2, %v3239_v2, %v2663_v38 }
  0xf5   : > { %v1398_v43 = vrot.slane %v1384_v31, %v3191_v50  ;;  %v1655_v19 = vsel %vm431_vm2, %v3241_v0, %v3240_v8  ;;  %v1656_v61 = vsel %vm431_vm2, %v3243_v22, %v3242_v1  ;;  %v1657_v58 = vmul.f32 %v1653_v36, %v1577_v23 }
  0xf6   : > { %v1346_v53 = vrot.slane %v1339_v37, %v3191_v50  ;;  %v1658_v35 = vmul.f32 %v1654_v41, %v1578_v46  ;;  %v1659_v10 = vmul.f32 %v1655_v19, %v1579_v52  ;;  %v1660_v57 = vmul.f32 %v1656_v61, %v1580_v30 }
  0xf7   : > { %v1399_v48 = vcombine.low %v1391_v34, %v1398_v43  ;;  %v3245_v28 = vunpack.c.l.bf16 %v3244_v13  ;;  %v3247_v12 = vunpack.c.l.bf16 %v3246_v26  ;;  %v3248_v25 = vunpack.c.h.bf16 %v3244_v13 }
  0xf8   : > { %1883 = vst.msk [vmem:[%s2868_s14 + $0x4] ss:$8 sm:$0xf] %vm2838_vm4, %v1346_v53  ;;  %v3250_v42 = vunpack.c.l.bf16 %v3249_v33  ;;  %v3251_v18 = vunpack.c.h.bf16 %v3249_v33  ;;  %v3252_v5 = vunpack.c.h.bf16 %v3246_v26  ;;  %v3254_v59 = vunpack.c.l.bf16 %v3253_v54 }
  0xf9   : > { %v1406_v38 = vrot.slane %v1399_v48, %v3191_v50  ;;  %v1673_v40 = vmul.f32 %v3245_v28, %v1657_v58  ;;  %v1733_v51 = vmul.f32 %v3247_v12, %v1657_v58  ;;  %v1674_v62 = vmul.f32 %v3248_v25, %v1658_v35 }
  0xfa   : > { %v1675_v49 = vmul.f32 %v3250_v42, %v1659_v10  ;;  %v1676_v29 = vmul.f32 %v3251_v18, %v1660_v57  ;;  %v1734_v27 = vmul.f32 %v3252_v5, %v1658_v35  ;;  %v1735_v21 = vmul.f32 %v3254_v59, %v1659_v10 }
  0xfb   : > { %1884 = vst.msk [vmem:[%s2868_s14 + $0x5] ss:$8 sm:$0xf] %vm2838_vm4, %v1406_v38  ;;  %v1677_v60 = vrot.slane %v1673_v40, 4  ;;  %v3255_v20 = vunpack.c.h.bf16 %v3253_v54  ;;  %v1737_v15 = vrot.slane %v1733_v51, 4  ;;  %v1683_v56 = vrot.slane %v1674_v62, 4 }
  0xfc   : > { %v1689_v24 = vrot.slane %v1675_v49, 4  ;;  %v1695_v4 = vrot.slane %v1676_v29, 4  ;;  %v1743_v9 = vrot.slane %v1734_v27, 4  ;;  %v1749_v32 = vrot.slane %v1735_v21, 4 }
  0xfd   : > { %v1736_v55 = vmul.f32 %v3255_v20, %v1660_v57  ;;  %v1678_v11 = vadd.f32 %v1677_v60, %v1673_v40  ;;  %v1738_v14 = vadd.f32 %v1737_v15, %v1733_v51  ;;  %v1684_v6 = vadd.f32 %v1683_v56, %v1674_v62 }
  0xfe   : > { %v1690_v31 = vadd.f32 %v1689_v24, %v1675_v49  ;;  %v1696_v45 = vadd.f32 %v1695_v4, %v1676_v29  ;;  %v1744_v39 = vadd.f32 %v1743_v9, %v1734_v27  ;;  %v1750_v63 = vadd.f32 %v1749_v32, %v1735_v21 }
  0xff   : > { %v1755_v17 = vrot.slane %v1736_v55, 4  ;;  %v1679_v16 = vrot.slane %v1678_v11, 2  ;;  %v1739_v3 = vrot.slane %v1738_v14, 2  ;;  %v1685_v47 = vrot.slane %v1684_v6, 2 }
 0x100   : > { %v1691_v23 = vrot.slane %v1690_v31, 2  ;;  %v1697_v34 = vrot.slane %v1696_v45, 2  ;;  %v1745_v43 = vrot.slane %v1744_v39, 2  ;;  %v1751_v37 = vrot.slane %v1750_v63, 2 }
 0x101   : > { %v1756_v44 = vadd.f32 %v1755_v17, %v1736_v55  ;;  %v1680_v46 = vadd.f32 %v1679_v16, %v1678_v11  ;;  %v1740_v52 = vadd.f32 %v1739_v3, %v1738_v14  ;;  %v1686_v36 = vadd.f32 %v1685_v47, %v1684_v6 }
 0x102   : > { %v1692_v2 = vadd.f32 %v1691_v23, %v1690_v31  ;;  %v1698_v41 = vadd.f32 %v1697_v34, %v1696_v45  ;;  %v1746_v48 = vadd.f32 %v1745_v43, %v1744_v39  ;;  %v1752_v19 = vadd.f32 %v1751_v37, %v1750_v63 }
 0x103   : > { %v1757_v30 = vrot.slane %v1756_v44, 2  ;;  %v1681_v8 = vrot.slane %v1680_v46, 1  ;;  %v1741_v0 = vrot.slane %v1740_v52, 1  ;;  %v1687_v22 = vrot.slane %v1686_v36, 1 }
 0x104   : > { %v1693_v61 = vrot.slane %v1692_v2, 1  ;;  %v1699_v58 = vrot.slane %v1698_v41, 1  ;;  %v1747_v53 = vrot.slane %v1746_v48, 1  ;;  %v1753_v57 = vrot.slane %v1752_v19, 1 }
 0x105   : > { %v1758_v1 = vadd.f32 %v1757_v30, %v1756_v44  ;;  %v1682_v35 = vadd.f32 %v1681_v8, %v1680_v46  ;;  %v1742_v10 = vadd.f32 %v1741_v0, %v1740_v52  ;;  %v1688_v13 = vadd.f32 %v1687_v22, %v1686_v36 }
 0x106   : > { %v1694_v28 = vadd.f32 %v1693_v61, %v1692_v2  ;;  %v1700_v40 = vadd.f32 %v1699_v58, %v1698_v41  ;;  %v1748_v26 = vadd.f32 %v1747_v53, %v1746_v48  ;;  %v1754_v12 = vadd.f32 %v1753_v57, %v1752_v19 }
 0x107   : > { %v1759_v38 = vrot.slane %v1758_v1, 1  ;;  %v1705_v25 = vcombine.low %v1682_v35, %v1688_v13 }
 0x108   : > { %v1706_v62 = vcombine.low %v1694_v28, %v1700_v40  ;;  %v1765_v33 = vcombine.low %v1742_v10, %v1748_v26 }
 0x109   : > { %v1760_v51 = vadd.f32 %v1759_v38, %v1758_v1  ;;  %v1713_v49 = vrot.slane %v1705_v25, %v3191_v50 }
 0x10a   : > { %v1720_v18 = vrot.slane %v1706_v62, %v3191_v50  ;;  %v1773_v29 = vrot.slane %v1765_v33, %v3191_v50 }
 0x10b   : > { %v1766_v42 = vcombine.low %v1754_v12, %v1760_v51 }
 0x10c   : > { %v1721_v27 = vcombine.low %v1713_v49, %v1720_v18 }
 0x10d   : > { %v1780_v5 = vrot.slane %v1766_v42, %v3191_v50 }
 0x10e   : > { %v1728_v54 = vrot.slane %v1721_v27, %v3191_v50 }
 0x10f   : > { %v1781_v60 = vcombine.low %v1773_v29, %v1780_v5 }
 0x110   : > { %1885 = vst.msk [vmem:[%s2868_s14 + $0x6] ss:$8 sm:$0xf] %vm2838_vm4, %v1728_v54 }
 0x111   : > { %v1788_v59 = vrot.slane %v1781_v60, %v3191_v50 }
 0x113   : > { %1886 = vst.msk [vmem:[%s2868_s14 + $0x7] ss:$8 sm:$0xf] %vm2838_vm4, %v1788_v59 }
 0x114 PF: > { %p10_p9 = scmp.ge.s32.totalorder %s1987_s16, 4   ;;  %s3256_s12 = smov %s1940_s13 }
 0x115   : > { %s3257_s13 = smov %s1996_s19  ;;  %s3258_s14 = smov %s1987_s16 }
 0x116   :  { %12 = sbr.rel (!%p10_p9) target bundleno = 2 (0x2), region = 100 }

</bundles_post_ra>
